<compile_context>
chip_gen: v5e
topology: v5e:2x2
jax: 0.10.0
libtpu: 0.0.40
codegen_flags: <defaults>
</compile_context>

<pallas_src>
import functools
import math

import jax
import jax.numpy as jnp
from jax import lax
from jax.experimental import pallas as pl
from jax.experimental.pallas import tpu as pltpu

IN_DIM = 768     # gloss BERT feature dim
OUT_DIM = 1024   # nn.Linear(768, 1024)


def _gloss_linear_kernel(labels_ref,   # (M, 1)  int32  VMEM
                         table_ref,    # (V, K)  bf16   VMEM (whole gloss table)
                         w_ref,        # (K, tn) int8   VMEM weight tile
                         scale_ref,    # (1, tn) f32    per-out-channel scale tile
                         b_ref,        # (1, tn) f32    bias tile
                         o_ref):       # (M, tn) f32    output tile
    m = labels_ref.shape[0]
    v = table_ref.shape[0]

    # In-VMEM gather as a one-hot matmul: layout-safe, no per-row DMAs, and
    # padded / out-of-range labels simply produce an all-zero row.
    eq = labels_ref[...] == lax.broadcasted_iota(jnp.int32, (m, v), 1)
    onehot = jnp.where(eq, 1.0, 0.0).astype(jnp.bfloat16)          # (M, V)
    x = jnp.dot(onehot, table_ref[...],
                preferred_element_type=jnp.float32)                # (M, K) exact gather

    # Dequant-after-dot: int8 weight -> bf16 for the MXU (v7x has no int MXU),
    # per-output-channel scale applied on the f32 accumulator (exact, since the
    # scale is constant along the contraction axis).
    w = w_ref[...].astype(jnp.float32).astype(jnp.bfloat16)        # (K, tn)
    y = jnp.dot(x.astype(jnp.bfloat16), w,
                preferred_element_type=jnp.float32)                # (M, tn) f32
    o_ref[...] = (y * scale_ref[...] + b_ref[...]).astype(o_ref.dtype)


@functools.partial(jax.jit, static_argnames=("tn",))
def _gloss_linear(labels2d, gloss_table, w_q, w_scale, b, *, tn=512):
    """out = gather(gloss_table, labels) @ dequant(w_q) + b

    labels2d:    (M, 1)  int32, M a multiple of 16
    gloss_table: (V, K)  bf16
    w_q:         (K, N)  int8  (transposed, per-out-channel quantized weight)
    w_scale:     (1, N)  f32
    b:           (N,)    f32
    returns:     (M, N)  f32
    """
    M = labels2d.shape[0]
    V, K = gloss_table.shape
    _, N = w_q.shape
    assert M % 16 == 0 and N % tn == 0 and tn % 128 == 0
    b2 = b.reshape(1, N).astype(jnp.float32)

    cost = pl.CostEstimate(
        flops=2 * M * V * K + 2 * M * K * N,
        transcendentals=0,
        bytes_accessed=(V * K * 2          # gloss table (bf16, fetched once)
                        + K * N * 1        # int8 weight
                        + 2 * N * 4        # scale + bias
                        + M * 4            # labels
                        + M * N * 4),      # f32 output
    )

    # TODO(synk): in a real model, pin w_q resident in VMEM across calls
    #   (cross-call prefetch or fuse into the surrounding kernel); in steady
    #   state that removes the entire weight HBM stream, the dominant cost.
    # TODO(synk): for large vocab V, replace whole-table residency with a
    #   deduped per-row DMA gather of only the live labels.
    # TODO(synk): for large batch add an M grid axis (tm=128 on v5e, 256 on
    #   v6e/v7x) so resident VMEM stays bounded as M grows.
    # TODO(synk): on v7x, fp8(e4m3) weights could feed the MXU natively.
    return pl.pallas_call(
        _gloss_linear_kernel,
        out_shape=jax.ShapeDtypeStruct((M, N), jnp.float32),
        grid_spec=pltpu.PrefetchScalarGridSpec(
            num_scalar_prefetch=0,
            grid=(N // tn,),                               # K collapsed: one dot per tile
            in_specs=[
                pl.BlockSpec((M, 1), lambda j: (0, 0)),    # labels
                pl.BlockSpec((V, K), lambda j: (0, 0)),    # whole gloss table (once)
                pl.BlockSpec((K, tn), lambda j: (0, j)),   # int8 weight tile
                pl.BlockSpec((1, tn), lambda j: (0, j)),   # per-channel scale tile
                pl.BlockSpec((1, tn), lambda j: (0, j)),   # bias tile
            ],
            out_specs=pl.BlockSpec((M, tn), lambda j: (0, j)),
        ),
        compiler_params=pltpu.CompilerParams(
            # No cross-step state -> v7x megacore may split the N tiles.
            dimension_semantics=("parallel",),
        ),
        cost_estimate=cost,
    )(labels2d, gloss_table, w_q, w_scale, b2)


def gloss_encoder_forward(labels, gloss_table, w_q, w_scale, b, *, tn=512):
    """Equivalent of gloss_encoder.forward(labels) -> (B, 1024) f32."""
    B = labels.shape[0]
    M = ((B + 15) // 16) * 16                     # pad batch to bf16 sublane tile
    # Padding label -1 matches no table row -> zero feature row (discarded).
    labels_p = jnp.full((M,), -1, jnp.int32).at[:B].set(labels.astype(jnp.int32))
    out = _gloss_linear(labels_p.reshape(M, 1), gloss_table, w_q, w_scale, b, tn=tn)
    return out[:B]


def init_params(key, vocab=32):
    """Deterministic synthetic params (module's __init__ loads a pickle we can't)."""
    k_tbl, k_w, k_b = jax.random.split(key, 3)
    # Synthetic gloss BERT feature table: stands in for gloss_feature_dict.
    gloss_table = jax.random.normal(k_tbl, (vocab, IN_DIM), dtype=jnp.float32)
    # nn.Linear(768, 1024) default init: U(-1/sqrt(in), 1/sqrt(in))
    bound = 1.0 / math.sqrt(IN_DIM)
    w = jax.random.uniform(k_w, (OUT_DIM, IN_DIM), minval=-bound, maxval=bound,
                           dtype=jnp.float32)
    b = jax.random.uniform(k_b, (OUT_DIM,), minval=-bound, maxval=bound,
                           dtype=jnp.float32)
    # Per-output-channel symmetric int8 quantization of the transposed weight.
    w_t = w.T                                                    # (768, 1024)
    amax = jnp.max(jnp.abs(w_t), axis=0, keepdims=True)          # (1, 1024)
    w_scale = jnp.maximum(amax / 127.0, 1e-12).astype(jnp.float32)
    w_q = jnp.clip(jnp.round(w_t / w_scale), -127, 127).astype(jnp.int8)
    # Gloss table stored bf16 (HBM-bound kernel), bias/scales f32.
    return gloss_table.astype(jnp.bfloat16), w_q, w_scale, b


if __name__ == "__main__":
    key = jax.random.PRNGKey(0)
    k_params, k_labels = jax.random.split(key)

    vocab = 32
    batch = 8
    gloss_table, w_q, w_scale, b = init_params(k_params, vocab=vocab)
    labels = jax.random.randint(k_labels, (batch,), 0, vocab, dtype=jnp.int32)

    out = gloss_encoder_forward(labels, gloss_table, w_q, w_scale, b)
    out = jax.block_until_ready(out)

    # Plain-JAX reference of the same math (same bf16 table, same int8 weights).
    w_deq = w_q.astype(jnp.float32) * w_scale
    gathered = jnp.take(gloss_table, labels, axis=0).astype(jnp.float32)
    ref = gathered @ w_deq + b

    assert out.shape == (batch, OUT_DIM), out.shape
    assert bool(jnp.allclose(out, ref, atol=1e-3, rtol=1e-3)), (
        float(jnp.max(jnp.abs(out - ref)))
    )

    print("KERNEL_OK")
</pallas_src>

<mosaic_0001>
module attributes {stable_mosaic.version = 11 : i64} {
  func.func @_gloss_linear_kernel(%arg0: i32, %arg1: memref<16x1xi32, #tpu.memory_space<vmem>>, %arg2: memref<32x768xbf16, #tpu.memory_space<vmem>>, %arg3: memref<768x512xi8, #tpu.memory_space<vmem>>, %arg4: memref<1x512xf32, #tpu.memory_space<vmem>>, %arg5: memref<1x512xf32, #tpu.memory_space<vmem>>, %arg6: memref<16x512xf32, #tpu.memory_space<vmem>>) attributes {dimension_semantics = [#tpu.dimension_semantics<parallel>], iteration_bounds = array<i64: 2>, scalar_prefetch = 0 : i64, scratch_operands = 0 : i64, tpu.core_type = #tpu.core_type<tc>, window_params = [{pipeline_mode = #tpu.pipeline_mode<synchronous>, transform_indices = @transform_0, window_bounds = array<i64: 16, 1>}, {pipeline_mode = #tpu.pipeline_mode<synchronous>, transform_indices = @transform_1, window_bounds = array<i64: 32, 768>}, {transform_indices = @transform_2, window_bounds = array<i64: 768, 512>}, {transform_indices = @transform_3, window_bounds = array<i64: 1, 512>}, {transform_indices = @transform_4, window_bounds = array<i64: 1, 512>}, {transform_indices = @transform_5, window_bounds = array<i64: 16, 512>}]} {
    %c0 = arith.constant 0 : index
    %c0_0 = arith.constant 0 : index
    %0 = vector.load %arg1[%c0, %c0_0] : memref<16x1xi32, #tpu.memory_space<vmem>>, vector<16x1xi32>
    %1 = tpu.iota {dimensions = array<i32: 1>} : vector<16x32xi32>
    %2 = vector.broadcast %0 : vector<16x1xi32> to vector<16x32xi32>
    %3 = arith.cmpi eq, %2, %1 : vector<16x32xi32>
    %cst = arith.constant 1.000000e+00 : f32
    %cst_1 = arith.constant 0.000000e+00 : f32
    %4 = vector.broadcast %cst : f32 to vector<16x32xf32>
    %5 = vector.broadcast %cst_1 : f32 to vector<16x32xf32>
    %6 = arith.select %3, %4, %5 : vector<16x32xi1>, vector<16x32xf32>
    %7 = arith.truncf %6 : vector<16x32xf32> to vector<16x32xbf16>
    %c0_2 = arith.constant 0 : index
    %c0_3 = arith.constant 0 : index
    %8 = vector.load %arg2[%c0_2, %c0_3] : memref<32x768xbf16, #tpu.memory_space<vmem>>, vector<32x768xbf16>
    %cst_4 = arith.constant dense<0.000000e+00> : vector<16x768xf32>
    %9 = tpu.matmul %7, %8, %cst_4 {dimension_numbers = #tpu.dot_dimension_numbers<[1], [0], [0], [1], [0, 0, 1, 1], [], []>} : vector<16x32xbf16>, vector<32x768xbf16>, vector<16x768xf32> -> vector<16x768xf32>
    %c0_5 = arith.constant 0 : index
    %c0_6 = arith.constant 0 : index
    %10 = vector.load %arg3[%c0_5, %c0_6] : memref<768x512xi8, #tpu.memory_space<vmem>>, vector<768x512xi8>
    %11 = arith.sitofp %10 : vector<768x512xi8> to vector<768x512xf32>
    %12 = arith.truncf %11 : vector<768x512xf32> to vector<768x512xbf16>
    %13 = arith.truncf %9 : vector<16x768xf32> to vector<16x768xbf16>
    %cst_7 = arith.constant dense<0.000000e+00> : vector<16x512xf32>
    %14 = tpu.matmul %13, %12, %cst_7 {dimension_numbers = #tpu.dot_dimension_numbers<[1], [0], [0], [1], [0, 0, 1, 1], [], []>} : vector<16x768xbf16>, vector<768x512xbf16>, vector<16x512xf32> -> vector<16x512xf32>
    %c0_8 = arith.constant 0 : index
    %c0_9 = arith.constant 0 : index
    %15 = vector.load %arg4[%c0_8, %c0_9] : memref<1x512xf32, #tpu.memory_space<vmem>>, vector<1x512xf32>
    %16 = vector.broadcast %15 : vector<1x512xf32> to vector<16x512xf32>
    %17 = arith.mulf %14, %16 : vector<16x512xf32>
    %c0_10 = arith.constant 0 : index
    %c0_11 = arith.constant 0 : index
    %18 = vector.load %arg5[%c0_10, %c0_11] : memref<1x512xf32, #tpu.memory_space<vmem>>, vector<1x512xf32>
    %19 = vector.broadcast %18 : vector<1x512xf32> to vector<16x512xf32>
    %20 = arith.addf %17, %19 : vector<16x512xf32>
    %c0_12 = arith.constant 0 : index
    %c0_13 = arith.constant 0 : index
    %21 = vector.load %arg6[%c0_12, %c0_13] : memref<16x512xf32, #tpu.memory_space<vmem>>, vector<16x512xf32>
    tpu.vector_store %arg6[%c0_12, %c0_13], %20 {strides = array<i32>} : memref<16x512xf32, #tpu.memory_space<vmem>>, vector<16x512xf32>,
    return
  }
  func.func @transform_0(%arg0: i32) -> (i32, i32) {
    %c0_i32 = arith.constant 0 : i32
    %c0_i32_0 = arith.constant 0 : i32
    %c0_i32_1 = arith.constant 0 : i32
    return %c0_i32, %c0_i32_0 : i32, i32
  }
  func.func @transform_1(%arg0: i32) -> (i32, i32) {
    %c0_i32 = arith.constant 0 : i32
    %c0_i32_0 = arith.constant 0 : i32
    %c0_i32_1 = arith.constant 0 : i32
    return %c0_i32, %c0_i32_0 : i32, i32
  }
  func.func @transform_2(%arg0: i32) -> (i32, i32) {
    %c0_i32 = arith.constant 0 : i32
    %c0_i32_0 = arith.constant 0 : i32
    return %c0_i32, %arg0 : i32, i32
  }
  func.func @transform_3(%arg0: i32) -> (i32, i32) {
    %c0_i32 = arith.constant 0 : i32
    %c0_i32_0 = arith.constant 0 : i32
    return %c0_i32, %arg0 : i32, i32
  }
  func.func @transform_4(%arg0: i32) -> (i32, i32) {
    %c0_i32 = arith.constant 0 : i32
    %c0_i32_0 = arith.constant 0 : i32
    return %c0_i32, %arg0 : i32, i32
  }
  func.func @transform_5(%arg0: i32) -> (i32, i32) {
    %c0_i32 = arith.constant 0 : i32
    %c0_i32_0 = arith.constant 0 : i32
    return %c0_i32, %arg0 : i32, i32
  }
}

</mosaic_0001>

<bundles_post_ra>
// kernel: _gloss_linear.1
= control target key start
LH: loop header
LB: loop body
LE: loop exit
PB: predicated region body
PF: predicated region fallthrough
CT: control target
= control target key end

     0   :  { %s3179_s0 = inlined_call_operand.vmem [shape: s32[16,1], index: 0, kind: input, shape index: {}]   ;;  %s3180_s1 = inlined_call_operand.hbm [shape: bf16[32,768], index: 1, kind: input, shape index: {}]   ;;  %s3181_s2 = inlined_call_operand.hbm [shape: s8[768,1024], index: 2, kind: input, shape index: {}]   ;;  %s3182_s3 = inlined_call_operand.vmem [shape: f32[1,1024], index: 3, kind: input, shape index: {}]   ;;  %s3183_s4 = inlined_call_operand.vmem [shape: f32[1,1024], index: 4, kind: input, shape index: {}]   ;;  %s3184_s5 = inlined_call_operand.hbm [shape: f32[16,1024], index: 5, kind: output, shape index: {}]  }
   0x1   :  { %3188 = sst [smem:[#allocation14_spill]] %s3180_s1 }
   0x2   :  { %10 = vsyncpa [#allocation3], 0 }
   0x3   :  { %11 = vsyncpa [#allocation6], 0 }
   0x4   :  { %13 = vsyncpa [#allocation6 + $0x1], 0 }
   0x5   :  { %14 = vsyncpa [#allocation4], 0 }
   0x6   :  { %16 = vsyncpa [#allocation4 + $0x1], 0  ;;  %s2366_s18 = smov 0   ;;  %s2368_s19 = smov 0  }
   0x7   :  { %s2370_s20 = smov 0   ;;  %s2372_s21 = smov 0  }
   0x8 LB: > { %s2387_s22 = sadd.s32 4294967295, %s2323_s21   ;;  %s2039_s23 = sadd.s32 4294967294, %s2323_s21   ;;  %s2323_s21 = sphi %s2372_s21, %s3239_s21   ;;  %s2319_s20 = sphi %s2370_s20, %s3238_s20   ;;  %s2315_s19 = sphi %s2368_s19, %s3237_s19   ;;  %s2311_s18 = sphi %s2366_s18, %s3236_s18  }
   0x9   : > { %p84_p0 = scmp.ne.s32.totalorder %s2315_s19, %s2311_s18  ;;  %p85_p1 = scmp.eq.s32.totalorder %s2387_s22, 0 }
   0xa   : > { %p160_p2 = scmp.eq.s32.totalorder %s2387_s22, 1  ;;  %p166_p3 = scmp.eq.s32.totalorder %s2039_s23, 1 }
   0xb   : > { %p2396_p4 = por %p85_p1, %p84_p0  ;;  %p2040_p5 = scmp.ge.s32.totalorder %s2323_s21, 1 }
   0xc   : > { %p2401_p6 = por %p166_p3, %p84_p0  ;;  %p173_p7 = scmp.lt.s32.totalorder %s2323_s21, 3 }
   0xd   : > { %s3191_s1 = sld [smem:[#allocation14_spill]]  ;;  %s2325_s30 = smov [#allocation2]  }
   0xe   : > { %p2409_p8 = pnand %p2040_p5, %p173_p7  ;;  %s189_s6 = sshll.u32 %s2325_s30, 4  ;;  %s190_s6 = int_to_ptr.vmem [resolvable:$true] %s189_s6 }
   0xf   : > { %s2419_s7 = sadd.s32 1, %s2323_s21   ;;  %s2326_s8 = smov 384  }
  0x10   : > { %p2133_p9 = pneg %p2409_p8  ;;  %s2327_s9 = smov 24  }
  0x11   : > { %s68_s10 = ssub.s32 %s2323_s21, %s2419_s7  ;;  %s71_s11 = sadd.s32 1, %s2319_s20 }
  0x12   : > { %p2134_p10 = pnand %p2133_p9, %p85_p1  ;;  %p69_p12 = scmp.eq.s32.totalorder %s68_s10, 0 }
  0x13   : > { %s187_s28 = sshll.u32 %s3191_s1, 4  ;;  %p78_p13 = scmp.ne.s32.totalorder %s2319_s20, %s2315_s19  ;;  %s188_s28 = int_to_ptr.hbm [resolvable:$true] %s187_s28 }
  0x14   : > { %2136 = dma.hbm_to_vmem [thread:$0]  (!%p2134_p10), %s188_s28, 1536, %s190_s6, [#allocation3], %s2326_s8, %s2326_s8, %s2327_s9  }
  0x15   : > { %p79_p0 = scmp.eq.s32.totalorder %s2323_s21, 0  ;;  %p2146_p3 = scmp.lt.s32.totalorder %s2323_s21, 2 }
  0x16   : > { %s2429_s12 = scalar_select %p69_p12, %s2319_s20, %s71_s11  }
  0x17   : > { %p80_p5 = por %p79_p0, %p78_p13  ;;  %p2433_p7 = por %p160_p2, %p78_p13 }
  0x18   : > { %s203_s14 = sand.u32 1, %s2319_s20   ;;  %s2109_s15 = sshll.u32 %s2323_s21, 5 }
  0x19   : > { %s2123_s16 = smul.u32 768, %s203_s14  ;;  %s212_s26 = scalar_lea.hbm %s3181_s2, %s2109_s15 }
  0x1a   : > { %p2442_p9 = pnand %p2146_p3, %p80_p5  ;;  %s213_s28 = sshll.u32 %s212_s26, 4  ;;  %s214_s28 = int_to_ptr.hbm [resolvable:$true] %s213_s28 }
  0x1b   : > { %s207_s30 = scalar_lea.vmem [#allocation5], %s2123_s16  ;;  %s204_s8 = scalar_lea.sflag [#allocation6], %s203_s14 }
  0x1c   : > { %s215_s6 = sshll.u32 %s207_s30, 4  ;;  %s2223_s9 = sshra.s32 %s214_s28, 4  ;;  %s216_s6 = int_to_ptr.vmem [resolvable:$true] %s215_s6  ;;  %s2224_s9 = int_to_ptr.hbm [resolvable:$true] %s2223_s9 }
  0x1d   : > { %s2225_s10 = scalar_lea.hbm %s2224_s9, 768  ;;  %p2227_p10 = pneg %p2442_p9 }
  0x1e   : > { %p2226_p2 = scmp.ne.s32.totalorder %s2224_s9, %s2225_s10  ;;  %s2230_s17 = scalar_lea.hbm %s3181_s2, 1536 }
  0x1f   : > { %p2231_p0 = scmp.lt.s32.totalorder %s2224_s9, %s3181_s2  ;;  %p2232_p3 = scmp.lt.s32.totalorder %s2230_s17, %s2225_s10 }
  0x20   : > { %p2228_p12 = pnand %p2227_p10, %p2226_p2 }
  0x21   : > { %p2233_p5 = por %p2232_p3, %p2231_p0 }
  0x22   : > { %p2229_p13 = pneg %p2228_p12 }
  0x24   : > { %p2234_p11 = pnand %p2233_p5, %p2229_p13 }
  0x26   : > { %2237 = shalt.err (!%p2234_p11)
}
  0x27   : > { %s2328_s14 = smov 1024   ;;  %s2329_s16 = smov 512  }
  0x28   : > { %s2330_s26 = smov 32   ;;  %243 = sbr.rel (%p2409_p8) target bundleno = 610 (0x262), region = 40 }
  0x29   : > { %2140 = dma.hbm_to_vmem [thread:$0]  (!%p2442_p9), %s214_s28, 12288, %s216_s6, %s204_s8, %s2328_s14, %s2329_s16, %s2330_s26  }
  0x2d   : > { %2298 = dma.done.wait (%p85_p1), [#allocation3], 1536  }
  0x2e   : > { %2300 = vsyncadd (%p85_p1), [#allocation3], 4294965760  ;;  %s2463_s1 = sand.u32 1, %s2315_s19  }
  0x2f   : > { %s2124_s30 = smul.u32 768, %s2463_s1  ;;  %s251_s9 = scalar_lea.sflag [#allocation6], %s2463_s1 }
  0x31   : > { %s2467_s10 = scalar_lea.vmem [#allocation5], %s2124_s30 }
  0x32   : > { %2302 = dma.done.wait (%p2396_p4), %s251_s9, 12288  }
  0x33   : > { %2304 = vsyncadd (%p2396_p4), %s251_s9, 4294955008  ;;  %v2331_v0 = vmov 0   ;;  %v303_v1 = vld [vmem:[%s3179_s0] sm:$0xff]  ;;  %v304_v2 = vld [vmem:[%s3179_s0 + $0x8] sm:$0xff]  ;;  %v305_v39 = vlaneseq  ;;  %v2332_v62 = vmov 0.0   ;;  %vm390_vm1 = vcmask 261120  }
  0x34   : > { %2192 = vset.pattern.permute.xlu0 %v2331_v0  ;;  %v2076_v3 = vld [vmem:[#allocation2 + $0x30] sm:$0xf]  ;;  %v2119_v4 = vld [vmem:[#allocation2 + $0x44] sm:$0xf0]  ;;  %v2116_v5 = vld [vmem:[#allocation2 + $0x34] sm:$0xf] }
  0x35   : > { %308 = vperm.xlu0 %2192, %v303_v1   ;;  %v2077_v6 = vor.u32 %v2119_v4, %v2076_v3  ;;  %v2078_v7 = vld [vmem:[#allocation2 + $0x48] sm:$0xf0]  ;;  %v2084_v8 = vld [vmem:[#allocation2 + $0x38] sm:$0xf]  ;;  %v2120_v9 = vld [vmem:[#allocation2 + $0x4c] sm:$0xf0] }
  0x36   : > { %v2081_v10 = vor.u32 %v2116_v5, %v2078_v7  ;;  %v2085_v11 = vor.u32 %v2120_v9, %v2084_v8  ;;  %v2117_v12 = vld [vmem:[#allocation2 + $0x3c] sm:$0xf]  ;;  %v2086_v13 = vld [vmem:[#allocation2 + $0x50] sm:$0xf0]  ;;  %v2052_v15 = vld [vmem:[#allocation2] sm:$0xf] }
  0x37   : > { %400 = vmatpush.bf16.msra.mxu0 %v2077_v6  ;;  %v2089_v14 = vor.u32 %v2117_v12, %v2086_v13  ;;  %v2113_v16 = vld [vmem:[#allocation2 + $0x14] sm:$0xf0]  ;;  %v2110_v17 = vld [vmem:[#allocation2 + $0x4] sm:$0xf]  ;;  %v2054_v19 = vld [vmem:[#allocation2 + $0x18] sm:$0xf0] }
  0x38   : > { %414 = vmatpush.bf16.msra.mxu1 %v2081_v10  ;;  %428 = vmatpush.bf16.msra.mxu2 %v2085_v11  ;;  %v2053_v18 = vor.u32 %v2113_v16, %v2052_v15  ;;  %v2060_v20 = vld [vmem:[#allocation2 + $0x8] sm:$0xf]  ;;  %v2114_v21 = vld [vmem:[#allocation2 + $0x1c] sm:$0xf0]  ;;  %v2057_v22 = vor.u32 %v2110_v17, %v2054_v19  ;;  %v2111_v24 = vld [vmem:[#allocation2 + $0xc] sm:$0xf] }
  0x39   : > { %442 = vmatpush.bf16.msra.mxu3 %v2089_v14  ;;  %v2061_v23 = vor.u32 %v2114_v21, %v2060_v20  ;;  %v2062_v25 = vld [vmem:[#allocation2 + $0x20] sm:$0xf0]  ;;  %v2092_v27 = vld [vmem:[#allocation2 + $0x40] sm:$0xf]  ;;  %v2121_v28 = vld [vmem:[#allocation2 + $0x54] sm:$0xf0] }
  0x3a   : > { %v2065_v26 = vor.u32 %v2111_v24, %v2062_v25  ;;  %v2118_v29 = vld [vmem:[#allocation2 + $0x44] sm:$0xf]  ;;  %v2093_v30 = vor.u32 %v2121_v28, %v2092_v27  ;;  %v2094_v31 = vld [vmem:[#allocation2 + $0x58] sm:$0xf0]  ;;  %v2068_v32 = vld [vmem:[#allocation2 + $0x10] sm:$0xf] }
  0x3b   : > { %401 = vmatpush.bf16.msra.mxu0 %v2053_v18  ;;  %v2115_v33 = vld [vmem:[#allocation2 + $0x24] sm:$0xf0]  ;;  %v2097_v34 = vor.u32 %v2118_v29, %v2094_v31  ;;  %v2112_v35 = vld [vmem:[#allocation2 + $0x14] sm:$0xf]  ;;  %v2070_v36 = vld [vmem:[#allocation2 + $0x28] sm:$0xf0] }
  0x3c   : > { %415 = vmatpush.bf16.msra.mxu1 %v2057_v22  ;;  %429 = vmatpush.bf16.msra.mxu2 %v2061_v23  ;;  %v2069_v37 = vor.u32 %v2115_v33, %v2068_v32  ;;  %v2073_v38 = vor.u32 %v2112_v35, %v2070_v36  ;;  %v2479_v40 = vand.u32 127, %v305_v39  ;;  %v490_v41 = vld [vmem:[%s2467_s10 + $0x60] sm:$0xff]  ;;  %s2048_s24 = sshll.u32 %s2387_s22, 2  ;;  %s2047_s16 = sshll.u32 %s2463_s1, 6 }
  0x3d   : > { %311 = vperm.xlu0 %2192, %v304_v2   ;;  %443 = vmatpush.bf16.msra.mxu3 %v2065_v26  ;;  %v506_v42 = vld [vmem:[%s2467_s10 + $0xe0] sm:$0xff]  ;;  %v630_v43 = vunpack.c.2.s8 %v490_v41  ;;  %v634_v44 = vunpack.c.3.s8 %v490_v41  ;;  %v622_v47 = vunpack.c.0.s8 %v490_v41  ;;  %v626_v48 = vunpack.c.1.s8 %v490_v41  ;;  %p292_p1 = scmp.lt.s32.totalorder %s2048_s24, 7  ;;  %s3129_s26 = scalar_lea.vmem [#allocation7], %s2047_s16 }
  0x3e   : > { %v694_v45 = vunpack.c.2.s8 %v506_v42  ;;  %v698_v46 = vunpack.c.3.s8 %v506_v42  ;;  %v686_v49 = vunpack.c.0.s8 %v506_v42  ;;  %v690_v50 = vunpack.c.1.s8 %v506_v42  ;;  %v522_v56 = vld [vmem:[%s2467_s10 + $0x160] sm:$0xff]  ;;  %s2122_s30 = sshll.u32 %s2387_s22, 5  ;;  %s1933_s27 = sshll.u32 %s3129_s26, 4  ;;  %s1934_s27 = int_to_ptr.vmem [resolvable:$true] %s1933_s27 }
  0x3f   : > { %456 = vmatpush.bf16.msrb.mxu0 %v2093_v30  ;;  %v1014_v52 = vcvt.s32.f32 %v630_v43  ;;  %v1018_v53 = vcvt.s32.f32 %v634_v44  ;;  %v538_v57 = vld [vmem:[%s2467_s10 + $0x1e0] sm:$0xff]  ;;  %v1006_v58 = vcvt.s32.f32 %v622_v47  ;;  %v1010_v59 = vcvt.s32.f32 %v626_v48  ;;  %s3241_s24 = smov (!%p292_p1, %s2048_s24), 7  ;;  %s1932_s29 = scalar_lea.hbm %s3184_s5, %s2122_s30 }
  0x40   : > { %470 = vmatpush.bf16.msrb.mxu1 %v2097_v34  ;;  %v1078_v54 = vcvt.s32.f32 %v694_v45  ;;  %v1082_v55 = vcvt.s32.f32 %v698_v46  ;;  %v1070_v60 = vcvt.s32.f32 %v686_v49  ;;  %v486_v61 = vld [vmem:[%s2467_s10 + $0x40] sm:$0xff]  ;;  %v1074_v2 = vcvt.s32.f32 %v690_v50  ;;  %s294_s15 = scalar_lea.vmem %s3182_s3, %s3241_s24  ;;  %s299_s14 = scalar_lea.vmem %s3183_s4, %s3241_s24 }
  0x41   : > { %v1370_v0 = vpack.c.bf16 %v1018_v53, %v1014_v52  ;;  %v502_v3 = vld [vmem:[%s2467_s10 + $0xc0] sm:$0xff]  ;;  %v1366_v4 = vpack.c.bf16 %v1010_v59, %v1006_v58  ;;  %v758_v5 = vunpack.c.2.s8 %v522_v56  ;;  %v762_v6 = vunpack.c.3.s8 %v522_v56  ;;  %s1935_s28 = sshll.u32 %s1932_s29, 4  ;;  %s1921_s22 = scalar_lea.sflag [#allocation4], %s2463_s1  ;;  %s1936_s28 = int_to_ptr.hbm [resolvable:$true] %s1935_s28 }
  0x42   : > { %v1402_v1 = vpack.c.bf16 %v1082_v55, %v1078_v54  ;;  %v822_v7 = vunpack.c.2.s8 %v538_v57  ;;  %v1398_v8 = vpack.c.bf16 %v1074_v2, %v1070_v60  ;;  %v826_v9 = vunpack.c.3.s8 %v538_v57  ;;  %v518_v32 = vld [vmem:[%s2467_s10 + $0x140] sm:$0xff]  ;;  %s2267_s6 = sshra.s32 %s1936_s28, 4  ;;  %s2268_s6 = int_to_ptr.hbm [resolvable:$true] %s2267_s6 }
  0x43   : > { %457 = vmatpush.bf16.msrb.mxu0 %v2069_v37  ;;  %1540 = vmatpush.bf16.msrb.mxu2 %v1370_v0  ;;  %v614_v10 = vunpack.c.2.s8 %v486_v61  ;;  %v618_v11 = vunpack.c.3.s8 %v486_v61  ;;  %v1142_v12 = vcvt.s32.f32 %v758_v5  ;;  %v1146_v13 = vcvt.s32.f32 %v762_v6  ;;  %v534_v37 = vld [vmem:[%s2467_s10 + $0x1c0] sm:$0xff]  ;;  %s2269_s24 = scalar_lea.hbm %s2268_s6, 64  ;;  %p2274_p9 = scmp.lt.s32.totalorder %s2268_s6, %s3184_s5 }
  0x44   : > { %471 = vmatpush.bf16.msrb.mxu1 %v2073_v38  ;;  %1554 = vmatpush.bf16.msrb.mxu3 %v1402_v1  ;;  %v1206_v14 = vcvt.s32.f32 %v822_v7  ;;  %v678_v15 = vunpack.c.2.s8 %v502_v3  ;;  %v1210_v16 = vcvt.s32.f32 %v826_v9  ;;  %v682_v19 = vunpack.c.3.s8 %v502_v3  ;;  %v482_v46 = vld [vmem:[%s2467_s10 + $0x20] sm:$0xff]  ;;  %p2270_p4 = scmp.ne.s32.totalorder %s2268_s6, %s2269_s24 }
  0x45   : > { %v998_v17 = vcvt.s32.f32 %v614_v10  ;;  %v1002_v18 = vcvt.s32.f32 %v618_v11  ;;  %v1434_v20 = vpack.c.bf16 %v1146_v13, %v1142_v12  ;;  %v750_v22 = vunpack.c.0.s8 %v522_v56 }
  0x46   : > { %v1062_v21 = vcvt.s32.f32 %v678_v15  ;;  %v754_v23 = vunpack.c.1.s8 %v522_v56  ;;  %v1466_v25 = vpack.c.bf16 %v1210_v16, %v1206_v14  ;;  %v1066_v27 = vcvt.s32.f32 %v682_v19  ;;  %v514_v16 = vld [vmem:[%s2467_s10 + $0x120] sm:$0xff]  ;;  %p2271_p8 = pnand %p2270_p4, %p2433_p7 }
  0x47   : > { %1541 = vmatpush.bf16.msrb.mxu2 %v1366_v4  ;;  %v1362_v26 = vpack.c.bf16 %v1002_v18, %v998_v17  ;;  %v814_v28 = vunpack.c.0.s8 %v538_v57  ;;  %v1134_v29 = vcvt.s32.f32 %v750_v22  ;;  %v818_v31 = vunpack.c.1.s8 %v538_v57 }
  0x48   : > { %1555 = vmatpush.bf16.msrb.mxu3 %v1398_v8  ;;  %v1138_v30 = vcvt.s32.f32 %v754_v23  ;;  %v1394_v34 = vpack.c.bf16 %v1066_v27, %v1062_v21  ;;  %v606_v36 = vunpack.c.0.s8 %v486_v61  ;;  %v610_v42 = vunpack.c.1.s8 %v486_v61  ;;  %v530_v21 = vld [vmem:[%s2467_s10 + $0x1a0] sm:$0xff]  ;;  %p2272_p11 = pneg %p2271_p8 }
  0x49   : > { %v1198_v35 = vcvt.s32.f32 %v814_v28  ;;  %v1202_v41 = vcvt.s32.f32 %v818_v31  ;;  %v674_v44 = vunpack.c.1.s8 %v502_v3  ;;  %v742_v45 = vunpack.c.2.s8 %v518_v32  ;;  %v494_v31 = vld [vmem:[%s2467_s10 + $0x80] sm:$0xff] }
  0x4a   : > { %v1430_v39 = vpack.c.bf16 %v1138_v30, %v1134_v29  ;;  %v990_v43 = vcvt.s32.f32 %v606_v36  ;;  %v994_v48 = vcvt.s32.f32 %v610_v42  ;;  %v746_v49 = vunpack.c.3.s8 %v518_v32 }
  0x4b   : > { %1542 = vmatpush.bf16.msrb.mxu2 %v1362_v26  ;;  %v1462_v47 = vpack.c.bf16 %v1202_v41, %v1198_v35  ;;  %v806_v50 = vunpack.c.2.s8 %v534_v37  ;;  %v1058_v53 = vcvt.s32.f32 %v674_v44  ;;  %v1126_v54 = vcvt.s32.f32 %v742_v45  ;;  %v478_v26 = vld [vmem:[%s2467_s10] sm:$0xff] }
  0x4c   : > { %1556 = vmatpush.bf16.msrb.mxu3 %v1394_v34  ;;  %v810_v55 = vunpack.c.3.s8 %v534_v37  ;;  %v1358_v56 = vpack.c.bf16 %v994_v48, %v990_v43  ;;  %v1130_v57 = vcvt.s32.f32 %v746_v49  ;;  %v598_v59 = vunpack.c.2.s8 %v482_v46 }
  0x4d   : > { %v1190_v58 = vcvt.s32.f32 %v806_v50  ;;  %v738_v7 = vunpack.c.1.s8 %v518_v32  ;;  %v798_v10 = vunpack.c.0.s8 %v534_v37  ;;  %v802_v11 = vunpack.c.1.s8 %v534_v37 }
  0x4e   : > { %v1194_v61 = vcvt.s32.f32 %v810_v55  ;;  %v1426_v0 = vpack.c.bf16 %v1130_v57, %v1126_v54  ;;  %v982_v1 = vcvt.s32.f32 %v598_v59  ;;  %v590_v14 = vunpack.c.0.s8 %v482_v46 }
  0x4f   : > { %1543 = vmatpush.bf16.msrb.mxu2 %v1358_v56  ;;  %v1122_v13 = vcvt.s32.f32 %v738_v7  ;;  %v594_v15 = vunpack.c.1.s8 %v482_v46  ;;  %v1182_v18 = vcvt.s32.f32 %v798_v10  ;;  %v1186_v19 = vcvt.s32.f32 %v802_v11  ;;  %v526_v11 = vld [vmem:[%s2467_s10 + $0x180] sm:$0xff] }
  0x50   : > { %v1458_v4 = vpack.c.bf16 %v1194_v61, %v1190_v58  ;;  %v974_v23 = vcvt.s32.f32 %v590_v14  ;;  %v726_v29 = vunpack.c.2.s8 %v514_v16  ;;  %v730_v30 = vunpack.c.3.s8 %v514_v16  ;;  %v554_v61 = vld [vmem:[%s2467_s10 + $0x260] sm:$0xff] }
  0x51   : > { %v1454_v27 = vpack.c.bf16 %v1186_v19, %v1182_v18  ;;  %v790_v34 = vunpack.c.2.s8 %v530_v21  ;;  %v794_v35 = vunpack.c.3.s8 %v530_v21  ;;  %v586_v41 = vunpack.c.3.s8 %v478_v26 }
  0x52   : > { %v1110_v36 = vcvt.s32.f32 %v726_v29  ;;  %v1114_v37 = vcvt.s32.f32 %v730_v30  ;;  %v646_v44 = vunpack.c.2.s8 %v494_v31  ;;  %v650_v48 = vunpack.c.3.s8 %v494_v31 }
  0x53   : > { %v1174_v43 = vcvt.s32.f32 %v790_v34  ;;  %v782_v55 = vunpack.c.0.s8 %v530_v21  ;;  %v786_v56 = vunpack.c.1.s8 %v530_v21  ;;  %v574_v59 = vunpack.c.0.s8 %v478_v26 }
  0x54   : > { %v1418_v45 = vpack.c.bf16 %v1114_v37, %v1110_v36  ;;  %v1030_v50 = vcvt.s32.f32 %v646_v44  ;;  %v1034_v54 = vcvt.s32.f32 %v650_v48  ;;  %v890_v10 = vunpack.c.3.s8 %v554_v61 }
  0x55   : > { %v878_v30 = vunpack.c.0.s8 %v554_v61 }
  0x57   : > { %v1262_v36 = vcvt.s32.f32 %v878_v30  ;;  %v546_v30 = vld [vmem:[%s2467_s10 + $0x220] sm:$0xff] }
  0xa7   : > { %v309_v51 = vpop.permute.xlu0 %308 }
  0xa8   : > { %vm313_vm0 = vcmp.eq.s32.totalorder %v309_v51, %v2479_v40  ;;  %v498_v51 = vld [vmem:[%s2467_s10 + $0xa0] sm:$0xff] }
  0xa9   : > { %v315_v63 = vsel %vm313_vm0, 1.0, %v2332_v62  ;;  %v666_v2 = vunpack.c.3.s8 %v498_v51 }
  0xab   : > { %v1050_v8 = vcvt.s32.f32 %v666_v2  ;;  %v570_v2 = vld [vmem:[%s2467_s10 + $0x2e0] sm:$0xff] }
  0xac   : > { %v950_v14 = vunpack.c.2.s8 %v570_v2  ;;  %v942_v34 = vunpack.c.0.s8 %v570_v2 }
  0xae   : > { %v1334_v21 = vcvt.s32.f32 %v950_v14 }
  0xaf   : > { %v312_v24 = vpop.permute.xlu0 %311 }
  0xb0   : > { %vm314_vm2 = vcmp.eq.s32.totalorder %v312_v24, %v2479_v40  ;;  %v670_v40 = vunpack.c.0.s8 %v502_v3  ;;  %v734_v3 = vunpack.c.0.s8 %v518_v32  ;;  %v978_v24 = vcvt.s32.f32 %v594_v15 }
  0xb1   : > { %v316_v33 = vsel %vm314_vm2, 1.0, %v2332_v62  ;;  %v602_v62 = vunpack.c.3.s8 %v482_v46  ;;  %v954_v15 = vunpack.c.3.s8 %v570_v2 }
  0xb2   : > { %v2491_v38 = vpack.c.bf16 %v316_v33, %v315_v63  ;;  %v1054_v52 = vcvt.s32.f32 %v670_v40  ;;  %v662_v63 = vunpack.c.2.s8 %v498_v51  ;;  %v1118_v9 = vcvt.s32.f32 %v734_v3 }
  0xb3   : > { %v986_v5 = vcvt.s32.f32 %v602_v62  ;;  %v1350_v32 = vpack.c.bf16 %v978_v24, %v974_v23  ;;  %v1178_v40 = vcvt.s32.f32 %v794_v35  ;;  %v1378_v62 = vpack.c.bf16 %v1034_v54, %v1030_v50 }
  0xb4   : > { %2098 = vmatmul.msk.bf16.vlgmr.msra.gmra.mxu0 %vm390_vm1, %v2491_v38  ;;  %2099 = vmatmul.msk.bf16.vlgmr.msra.gmra.mxu1 %vm390_vm1, %v2491_v38  ;;  %v1390_v60 = vpack.c.bf16 %v1058_v53, %v1054_v52  ;;  %v1046_v6 = vcvt.s32.f32 %v662_v63  ;;  %v1422_v22 = vpack.c.bf16 %v1122_v13, %v1118_v9  ;;  %v722_v52 = vunpack.c.1.s8 %v514_v16 }
  0xb5   : > { %2100 = vmatmul.msk.bf16.vlgmr.msra.gmra.mxu2 %vm390_vm1, %v2491_v38  ;;  %2101 = vmatmul.msk.bf16.vlgmr.msra.gmra.mxu3 %vm390_vm1, %v2491_v38  ;;  %v1354_v12 = vpack.c.bf16 %v986_v5, %v982_v1  ;;  %v1450_v49 = vpack.c.bf16 %v1178_v40, %v1174_v43  ;;  %v1166_v63 = vcvt.s32.f32 %v782_v55  ;;  %v638_v1 = vunpack.c.0.s8 %v494_v31 }
  0xb6   : > { %1568 = vmatpush.bf16.msra.mxu0 %v1434_v20  ;;  %1582 = vmatpush.bf16.msra.mxu1 %v1466_v25  ;;  %v1386_v17 = vpack.c.bf16 %v1050_v8, %v1046_v6  ;;  %v654_v20 = vunpack.c.0.s8 %v498_v51  ;;  %v658_v25 = vunpack.c.1.s8 %v498_v51  ;;  %v718_v51 = vunpack.c.0.s8 %v514_v16  ;;  %v510_v6 = vld [vmem:[%s2467_s10 + $0x100] sm:$0xff] }
  0xb7   : > { %1557 = vmatpush.bf16.msrb.mxu3 %v1390_v60  ;;  %1544 = vmatpush.bf16.msrb.mxu2 %v1354_v12  ;;  %v1106_v58 = vcvt.s32.f32 %v722_v52  ;;  %v578_v60 = vunpack.c.1.s8 %v478_v26  ;;  %v958_v3 = vcvt.s32.f32 %v574_v59  ;;  %v642_v5 = vunpack.c.1.s8 %v494_v31 }
  0xb8   : > { %v1038_v28 = vcvt.s32.f32 %v654_v20  ;;  %v1042_v33 = vcvt.s32.f32 %v658_v25  ;;  %v1102_v57 = vcvt.s32.f32 %v718_v51  ;;  %v1022_v8 = vcvt.s32.f32 %v638_v1  ;;  %v550_v51 = vld [vmem:[%s2467_s10 + $0x240] sm:$0xff] }
  0xb9   : > { %v886_v9 = vunpack.c.2.s8 %v554_v61  ;;  %v1026_v13 = vcvt.s32.f32 %v642_v5  ;;  %v710_v18 = vunpack.c.2.s8 %v510_v6  ;;  %v714_v19 = vunpack.c.3.s8 %v510_v6 }
  0xba   : > { %1569 = vmatpush.bf16.msra.mxu0 %v1430_v39  ;;  %1583 = vmatpush.bf16.msra.mxu1 %v1462_v47  ;;  %v582_v39 = vunpack.c.2.s8 %v478_v26  ;;  %v1382_v42 = vpack.c.bf16 %v1042_v33, %v1038_v28  ;;  %v970_v47 = vcvt.s32.f32 %v586_v41  ;;  %v774_v23 = vunpack.c.2.s8 %v526_v11 }
  0xbb   : > { %1558 = vmatpush.bf16.msrb.mxu3 %v1386_v17  ;;  %1545 = vmatpush.bf16.msrb.mxu2 %v1350_v32  ;;  %v1270_v16 = vcvt.s32.f32 %v886_v9  ;;  %v1274_v17 = vcvt.s32.f32 %v890_v10  ;;  %v1374_v20 = vpack.c.bf16 %v1026_v13, %v1022_v8  ;;  %v1094_v25 = vcvt.s32.f32 %v710_v18 }
  0xbc   : > { %v966_v46 = vcvt.s32.f32 %v582_v39  ;;  %v1098_v26 = vcvt.s32.f32 %v714_v19  ;;  %v1158_v29 = vcvt.s32.f32 %v774_v23  ;;  %v882_v31 = vunpack.c.1.s8 %v554_v61 }
  0xbd   : > { %v1498_v24 = vpack.c.bf16 %v1274_v17, %v1270_v16  ;;  %v946_v35 = vunpack.c.1.s8 %v570_v2  ;;  %v702_v39 = vunpack.c.0.s8 %v510_v6  ;;  %v706_v41 = vunpack.c.1.s8 %v510_v6 }
  0xbe   : > { %1570 = vmatpush.bf16.msra.mxu0 %v1426_v0  ;;  %1584 = vmatpush.bf16.msra.mxu1 %v1458_v4  ;;  %v1346_v53 = vpack.c.bf16 %v970_v47, %v966_v46  ;;  %v1170_v0 = vcvt.s32.f32 %v786_v56  ;;  %v962_v4 = vcvt.s32.f32 %v578_v60  ;;  %v1410_v32 = vpack.c.bf16 %v1098_v26, %v1094_v25  ;;  %v507_v46 = vld [vmem:[%s2467_s10 + $0xe8] sm:$0xff]  ;;  %v566_v56 = vld [vmem:[%s2467_s10 + $0x2c0] sm:$0xff] }
  0xbf   : > { %1559 = vmatpush.bf16.msrb.mxu3 %v1382_v42  ;;  %v1266_v37 = vcvt.s32.f32 %v882_v31  ;;  %v491_v42 = vld [vmem:[%s2467_s10 + $0x68] sm:$0xff]  ;;  %v1326_v40 = vcvt.s32.f32 %v942_v34  ;;  %v1330_v44 = vcvt.s32.f32 %v946_v35  ;;  %v1086_v48 = vcvt.s32.f32 %v702_v39  ;;  %v562_v35 = vld [vmem:[%s2467_s10 + $0x2a0] sm:$0xff] }
  0xc0   : > { %1546 = vmatpush.bf16.msrb.mxu2 %v1346_v53  ;;  %v1446_v7 = vpack.c.bf16 %v1170_v0, %v1166_v63  ;;  %v1342_v12 = vpack.c.bf16 %v962_v4, %v958_v3  ;;  %v770_v50 = vunpack.c.1.s8 %v526_v11  ;;  %v631_v54 = vunpack.c.2.s8 %v491_v42  ;;  %v503_v25 = vld [vmem:[%s2467_s10 + $0xc8] sm:$0xff] }
  0xc1   : > { %v1494_v47 = vpack.c.bf16 %v1266_v37, %v1262_v36  ;;  %v1526_v52 = vpack.c.bf16 %v1330_v44, %v1326_v40  ;;  %v635_v55 = vunpack.c.3.s8 %v491_v42  ;;  %v695_v59 = vunpack.c.2.s8 %v507_v46 }
  0xc2   : > { %1571 = vmatpush.bf16.msra.mxu0 %v1422_v22  ;;  %1585 = vmatpush.bf16.msra.mxu1 %v1454_v27  ;;  %v1338_v22 = vcvt.s32.f32 %v954_v15  ;;  %v778_v27 = vunpack.c.3.s8 %v526_v11  ;;  %v699_v60 = vunpack.c.3.s8 %v507_v46  ;;  %v1015_v61 = vcvt.s32.f32 %v631_v54 }
  0xc3   : > { %1560 = vmatpush.bf16.msrb.mxu3 %v1378_v62  ;;  %v1019_v62 = vcvt.s32.f32 %v635_v55  ;;  %v870_v63 = vunpack.c.2.s8 %v550_v51  ;;  %v874_v0 = vunpack.c.3.s8 %v550_v51  ;;  %v1079_v2 = vcvt.s32.f32 %v695_v59 }
  0xc4   : > { %2102 = vmatmul.msk.bf16.vlgmr.msrb.gmra.mxu0 %vm390_vm1, %v2491_v38  ;;  %2103 = vmatmul.msk.bf16.vlgmr.msrb.gmra.mxu1 %vm390_vm1, %v2491_v38  ;;  %v1414_v38 = vpack.c.bf16 %v1106_v58, %v1102_v57  ;;  %v1530_v28 = vpack.c.bf16 %v1338_v22, %v1334_v21  ;;  %v1162_v33 = vcvt.s32.f32 %v778_v27  ;;  %v1154_v58 = vcvt.s32.f32 %v770_v50 }
  0xc5   : > { %1547 = vmatpush.bf16.msrb.mxu2 %v1342_v12  ;;  %v934_v3 = vunpack.c.2.s8 %v566_v56  ;;  %v1371_v4 = vpack.c.bf16 %v1019_v62, %v1015_v61  ;;  %v1254_v5 = vcvt.s32.f32 %v870_v63  ;;  %v1258_v6 = vcvt.s32.f32 %v874_v0 }
  0xc6   : > { %1572 = vmatpush.bf16.msra.mxu0 %v1418_v45  ;;  %1586 = vmatpush.bf16.msra.mxu1 %v1450_v49  ;;  %v1442_v43 = vpack.c.bf16 %v1162_v33, %v1158_v29  ;;  %v766_v45 = vunpack.c.0.s8 %v526_v11  ;;  %v1090_v49 = vcvt.s32.f32 %v706_v41  ;;  %v623_v10 = vunpack.c.0.s8 %v491_v42 }
  0xc7   : > { %1561 = vmatpush.bf16.msrb.mxu3 %v1374_v20  ;;  %v1318_v9 = vcvt.s32.f32 %v934_v3  ;;  %v627_v11 = vunpack.c.1.s8 %v491_v42  ;;  %v1490_v12 = vpack.c.bf16 %v1258_v6, %v1254_v5  ;;  %v687_v14 = vunpack.c.0.s8 %v507_v46  ;;  %v487_v20 = vld [vmem:[%s2467_s10 + $0x48] sm:$0xff] }
  0xc8   : > { %v1150_v53 = vcvt.s32.f32 %v766_v45  ;;  %v1406_v57 = vpack.c.bf16 %v1090_v49, %v1086_v48  ;;  %v691_v15 = vunpack.c.1.s8 %v507_v46  ;;  %v1007_v16 = vcvt.s32.f32 %v623_v10  ;;  %v483_v5 = vld [vmem:[%s2467_s10 + $0x28] sm:$0xff] }
  0xc9   : > { %1596 = vmatpush.bf16.msra.mxu2 %v1498_v24  ;;  %v1011_v17 = vcvt.s32.f32 %v627_v11  ;;  %v862_v18 = vunpack.c.0.s8 %v550_v51  ;;  %v866_v19 = vunpack.c.1.s8 %v550_v51  ;;  %v1071_v22 = vcvt.s32.f32 %v687_v14  ;;  %v499_v6 = vld [vmem:[%s2467_s10 + $0xa8] sm:$0xff] }
  0xca   : > { %1573 = vmatpush.bf16.msra.mxu0 %v1414_v38  ;;  %1587 = vmatpush.bf16.msra.mxu1 %v1446_v7  ;;  %v1438_v1 = vpack.c.bf16 %v1154_v58, %v1150_v53  ;;  %v1083_v38 = vcvt.s32.f32 %v699_v60  ;;  %v938_v7 = vunpack.c.3.s8 %v566_v56  ;;  %v1075_v23 = vcvt.s32.f32 %v691_v15  ;;  %v542_v15 = vld [vmem:[%s2467_s10 + $0x200] sm:$0xff] }
  0xcb   : > { %1610 = vmatpush.bf16.msra.mxu3 %v1530_v28  ;;  %v926_v24 = vunpack.c.0.s8 %v566_v56  ;;  %v1367_v26 = vpack.c.bf16 %v1011_v17, %v1007_v16  ;;  %v1246_v27 = vcvt.s32.f32 %v862_v18  ;;  %v1250_v28 = vcvt.s32.f32 %v866_v19  ;;  %v558_v16 = vld [vmem:[%s2467_s10 + $0x280] sm:$0xff] }
  0xcc   : > { %v1403_v8 = vpack.c.bf16 %v1083_v38, %v1079_v2  ;;  %v1322_v13 = vcvt.s32.f32 %v938_v7  ;;  %v930_v29 = vunpack.c.1.s8 %v566_v56  ;;  %v1399_v31 = vpack.c.bf16 %v1075_v23, %v1071_v22 }
  0xcd   : > { %1597 = vmatpush.bf16.msra.mxu2 %v1494_v47  ;;  %v615_v33 = vunpack.c.2.s8 %v487_v20  ;;  %v619_v34 = vunpack.c.3.s8 %v487_v20  ;;  %v1486_v36 = vpack.c.bf16 %v1250_v28, %v1246_v27  ;;  %v679_v39 = vunpack.c.2.s8 %v503_v25 }
  0xce   : > { %1574 = vmatpush.bf16.msra.mxu0 %v1410_v32  ;;  %1588 = vmatpush.bf16.msra.mxu1 %v1442_v43  ;;  %v1522_v21 = vpack.c.bf16 %v1322_v13, %v1318_v9  ;;  %v1310_v32 = vcvt.s32.f32 %v926_v24  ;;  %v1314_v37 = vcvt.s32.f32 %v930_v29  ;;  %v683_v41 = vunpack.c.3.s8 %v503_v25 }
  0xcf   : > { %1611 = vmatpush.bf16.msra.mxu3 %v1526_v52  ;;  %v999_v42 = vcvt.s32.f32 %v615_v33  ;;  %v1003_v43 = vcvt.s32.f32 %v619_v34  ;;  %v854_v40 = vunpack.c.2.s8 %v546_v30  ;;  %v858_v44 = vunpack.c.3.s8 %v546_v30 }
  0xd0   : > { %v1518_v45 = vpack.c.bf16 %v1314_v37, %v1310_v32  ;;  %v1063_v46 = vcvt.s32.f32 %v679_v39  ;;  %v1067_v47 = vcvt.s32.f32 %v683_v41  ;;  %v918_v48 = vunpack.c.2.s8 %v562_v35 }
  0xd1   : > { %1598 = vmatpush.bf16.msra.mxu2 %v1490_v12  ;;  %v1363_v49 = vpack.c.bf16 %v1003_v43, %v999_v42  ;;  %v1238_v50 = vcvt.s32.f32 %v854_v40  ;;  %v1242_v51 = vcvt.s32.f32 %v858_v44  ;;  %v922_v52 = vunpack.c.3.s8 %v562_v35  ;;  %v523_v43 = vld [vmem:[%s2467_s10 + $0x168] sm:$0xff] }
  0xd2   : > { %1575 = vmatpush.bf16.msra.mxu0 %v1406_v57  ;;  %1589 = vmatpush.bf16.msra.mxu1 %v1438_v1  ;;  %v1395_v53 = vpack.c.bf16 %v1067_v47, %v1063_v46  ;;  %v1302_v54 = vcvt.s32.f32 %v918_v48  ;;  %v607_v58 = vunpack.c.0.s8 %v487_v20  ;;  %v611_v59 = vunpack.c.1.s8 %v487_v20 }
  0xd3   : > { %1612 = vmatpush.bf16.msra.mxu3 %v1522_v21  ;;  %v1482_v55 = vpack.c.bf16 %v1242_v51, %v1238_v50  ;;  %v1306_v56 = vcvt.s32.f32 %v922_v52  ;;  %v671_v60 = vunpack.c.0.s8 %v503_v25  ;;  %v675_v61 = vunpack.c.1.s8 %v503_v25  ;;  %v539_v51 = vld [vmem:[%s2467_s10 + $0x1e8] sm:$0xff] }
  0xd4   : > { %v991_v62 = vcvt.s32.f32 %v607_v58  ;;  %v995_v63 = vcvt.s32.f32 %v611_v59  ;;  %v846_v2 = vunpack.c.0.s8 %v546_v30  ;;  %v850_v38 = vunpack.c.1.s8 %v546_v30 }
  0xd5   : > { %1599 = vmatpush.bf16.msra.mxu2 %v1486_v36  ;;  %v1514_v57 = vpack.c.bf16 %v1306_v56, %v1302_v54  ;;  %v1055_v0 = vcvt.s32.f32 %v671_v60  ;;  %v1059_v1 = vcvt.s32.f32 %v675_v61  ;;  %v910_v3 = vunpack.c.0.s8 %v562_v35  ;;  %v479_v56 = vld [vmem:[%s2467_s10 + $0x8] sm:$0xff] }
  0xd6   : > { %1624 = vmatpush.bf16.msrb.mxu0 %v1371_v4  ;;  %1638 = vmatpush.bf16.msrb.mxu1 %v1403_v8  ;;  %v914_v4 = vunpack.c.1.s8 %v562_v35  ;;  %v1359_v7 = vpack.c.bf16 %v995_v63, %v991_v62  ;;  %v599_v9 = vunpack.c.2.s8 %v483_v5  ;;  %v603_v10 = vunpack.c.3.s8 %v483_v5  ;;  %v495_v61 = vld [vmem:[%s2467_s10 + $0x88] sm:$0xff] }
  0xd7   : > { %1613 = vmatpush.bf16.msra.mxu3 %v1518_v45  ;;  %v1391_v8 = vpack.c.bf16 %v1059_v1, %v1055_v0  ;;  %v1230_v11 = vcvt.s32.f32 %v846_v2  ;;  %v1234_v12 = vcvt.s32.f32 %v850_v38  ;;  %v1294_v13 = vcvt.s32.f32 %v910_v3 }
  0xd8   : > { %v1298_v14 = vcvt.s32.f32 %v914_v4  ;;  %v983_v17 = vcvt.s32.f32 %v599_v9  ;;  %v987_v18 = vcvt.s32.f32 %v603_v10  ;;  %v663_v19 = vunpack.c.2.s8 %v499_v6 }
  0xd9   : > { %1600 = vmatpush.bf16.msra.mxu2 %v1482_v55  ;;  %v667_v20 = vunpack.c.3.s8 %v499_v6  ;;  %v1478_v21 = vpack.c.bf16 %v1234_v12, %v1230_v11  ;;  %v838_v23 = vunpack.c.2.s8 %v542_v15  ;;  %v842_v24 = vunpack.c.3.s8 %v542_v15 }
  0xda   : > { %1625 = vmatpush.bf16.msrb.mxu0 %v1367_v26  ;;  %1639 = vmatpush.bf16.msrb.mxu1 %v1399_v31  ;;  %v1510_v22 = vpack.c.bf16 %v1298_v14, %v1294_v13  ;;  %v1355_v25 = vpack.c.bf16 %v987_v18, %v983_v17  ;;  %v1047_v26 = vcvt.s32.f32 %v663_v19  ;;  %v902_v28 = vunpack.c.2.s8 %v558_v16 }
  0xdb   : > { %1614 = vmatpush.bf16.msra.mxu3 %v1514_v57  ;;  %v1051_v27 = vcvt.s32.f32 %v667_v20  ;;  %v1222_v29 = vcvt.s32.f32 %v838_v23  ;;  %v1226_v30 = vcvt.s32.f32 %v842_v24  ;;  %v906_v31 = vunpack.c.3.s8 %v558_v16 }
  0xdc   : > { %v591_v32 = vunpack.c.0.s8 %v483_v5  ;;  %v1286_v34 = vcvt.s32.f32 %v902_v28  ;;  %v595_v35 = vunpack.c.1.s8 %v483_v5  ;;  %v655_v36 = vunpack.c.0.s8 %v499_v6 }
  0xdd   : > { %1601 = vmatpush.bf16.msra.mxu2 %v1478_v21  ;;  %v1387_v33 = vpack.c.bf16 %v1051_v27, %v1047_v26  ;;  %v1474_v37 = vpack.c.bf16 %v1226_v30, %v1222_v29  ;;  %v1290_v39 = vcvt.s32.f32 %v906_v31  ;;  %v659_v42 = vunpack.c.1.s8 %v499_v6  ;;  %v555_v21 = vld [vmem:[%s2467_s10 + $0x268] sm:$0xff] }
  0xde   : > { %1626 = vmatpush.bf16.msrb.mxu0 %v1363_v49  ;;  %1640 = vmatpush.bf16.msrb.mxu1 %v1395_v53  ;;  %v975_v41 = vcvt.s32.f32 %v591_v32  ;;  %v979_v40 = vcvt.s32.f32 %v595_v35  ;;  %v1039_v44 = vcvt.s32.f32 %v655_v36  ;;  %v830_v45 = vunpack.c.0.s8 %v542_v15  ;;  %v571_v30 = vld [vmem:[%s2467_s10 + $0x2e8] sm:$0xff] }
  0xdf   : > { %1615 = vmatpush.bf16.msra.mxu3 %v1510_v22  ;;  %v834_v46 = vunpack.c.1.s8 %v542_v15  ;;  %v1506_v47 = vpack.c.bf16 %v1290_v39, %v1286_v34  ;;  %v1043_v48 = vcvt.s32.f32 %v659_v42  ;;  %v894_v49 = vunpack.c.0.s8 %v558_v16  ;;  %v519_v35 = vld [vmem:[%s2467_s10 + $0x148] sm:$0xff] }
  0xe0   : > { %v898_v50 = vunpack.c.1.s8 %v558_v16  ;;  %v1351_v52 = vpack.c.bf16 %v979_v40, %v975_v41  ;;  %v1214_v53 = vcvt.s32.f32 %v830_v45  ;;  %v759_v55 = vunpack.c.2.s8 %v523_v43  ;;  %v535_v42 = vld [vmem:[%s2467_s10 + $0x1c8] sm:$0xff] }
  0xe1   : > { %1602 = vmatpush.bf16.msra.mxu2 %v1474_v37  ;;  %v1218_v54 = vcvt.s32.f32 %v834_v46  ;;  %v1383_v57 = vpack.c.bf16 %v1043_v48, %v1039_v44  ;;  %v1278_v58 = vcvt.s32.f32 %v894_v49  ;;  %v763_v60 = vunpack.c.3.s8 %v523_v43 }
  0xe2   : > { %1627 = vmatpush.bf16.msrb.mxu0 %v1359_v7  ;;  %1641 = vmatpush.bf16.msrb.mxu1 %v1391_v8  ;;  %v1282_v59 = vcvt.s32.f32 %v898_v50  ;;  %v2531_v63 = vcvt.s32.f32 %v759_v55  ;;  %v823_v0 = vunpack.c.2.s8 %v539_v51  ;;  %v827_v1 = vunpack.c.3.s8 %v539_v51 }
  0xe3   : > { %1616 = vmatpush.bf16.msra.mxu3 %v1506_v47  ;;  %v1470_v62 = vpack.c.bf16 %v1218_v54, %v1214_v53  ;;  %v2533_v38 = vcvt.s32.f32 %v763_v60  ;;  %v583_v3 = vunpack.c.2.s8 %v479_v56  ;;  %v587_v4 = vunpack.c.3.s8 %v479_v56 }
  0xe4   : > { %v1502_v2 = vpack.c.bf16 %v1282_v59, %v1278_v58  ;;  %v2535_v5 = vcvt.s32.f32 %v823_v0  ;;  %v2537_v6 = vcvt.s32.f32 %v827_v1  ;;  %v647_v7 = vunpack.c.2.s8 %v495_v61 }
  0xe5   : > { %1603 = vmatpush.bf16.msra.mxu2 %v1470_v62  ;;  %v651_v8 = vunpack.c.3.s8 %v495_v61  ;;  %v1435_v9 = vpack.c.bf16 %v2533_v38, %v2531_v63  ;;  %v967_v10 = vcvt.s32.f32 %v583_v3  ;;  %v971_v11 = vcvt.s32.f32 %v587_v4  ;;  %v551_v3 = vld [vmem:[%s2467_s10 + $0x248] sm:$0xff] }
  0xe6   : > { %1628 = vmatpush.bf16.msrb.mxu0 %v1355_v25  ;;  %1642 = vmatpush.bf16.msrb.mxu1 %v1387_v33  ;;  %v751_v12 = vunpack.c.0.s8 %v523_v43  ;;  %v1467_v13 = vpack.c.bf16 %v2537_v6, %v2535_v5  ;;  %v1031_v14 = vcvt.s32.f32 %v647_v7  ;;  %v755_v16 = vunpack.c.1.s8 %v523_v43  ;;  %v511_v4 = vld [vmem:[%s2467_s10 + $0x108] sm:$0xff] }
  0xe7   : > { %1617 = vmatpush.bf16.msra.mxu3 %v1502_v2  ;;  %v1035_v15 = vcvt.s32.f32 %v651_v8  ;;  %v1347_v17 = vpack.c.bf16 %v971_v11, %v967_v10  ;;  %v815_v19 = vunpack.c.0.s8 %v539_v51  ;;  %v819_v20 = vunpack.c.1.s8 %v539_v51 }
  0xe8   : > { %v2543_v18 = vcvt.s32.f32 %v751_v12  ;;  %v2546_v23 = vcvt.s32.f32 %v755_v16  ;;  %v575_v24 = vunpack.c.0.s8 %v479_v56  ;;  %v579_v25 = vunpack.c.1.s8 %v479_v56  ;;  %v567_v16 = vld [vmem:[%s2467_s10 + $0x2c8] sm:$0xff] }
  0xe9   : > { %v1379_v22 = vpack.c.bf16 %v1035_v15, %v1031_v14  ;;  %v2548_v26 = vcvt.s32.f32 %v815_v19  ;;  %v2550_v27 = vcvt.s32.f32 %v819_v20  ;;  %v639_v28 = vunpack.c.0.s8 %v495_v61 }
  0xea   : > { %1629 = vmatpush.bf16.msrb.mxu0 %v1351_v52  ;;  %1643 = vmatpush.bf16.msrb.mxu1 %v1383_v57  ;;  %v643_v29 = vunpack.c.1.s8 %v495_v61  ;;  %v959_v32 = vcvt.s32.f32 %v575_v24  ;;  %v963_v33 = vcvt.s32.f32 %v579_v25  ;;  %v887_v34 = vunpack.c.2.s8 %v555_v21 }
  0xeb   : > { %v1023_v37 = vcvt.s32.f32 %v639_v28  ;;  %v891_v41 = vunpack.c.3.s8 %v555_v21  ;;  %v951_v44 = vunpack.c.2.s8 %v571_v30  ;;  %v955_v45 = vunpack.c.3.s8 %v571_v30 }
  0xec   : > { %v1027_v39 = vcvt.s32.f32 %v643_v29  ;;  %v1343_v43 = vpack.c.bf16 %v963_v33, %v959_v32  ;;  %v2559_v40 = vcvt.s32.f32 %v887_v34  ;;  %v743_v48 = vunpack.c.2.s8 %v519_v35 }
  0xed   : > { %v2561_v47 = vcvt.s32.f32 %v891_v41  ;;  %v747_v49 = vunpack.c.3.s8 %v519_v35  ;;  %v2563_v50 = vcvt.s32.f32 %v951_v44  ;;  %v2565_v51 = vcvt.s32.f32 %v955_v45 }
  0xee   : > { %1630 = vmatpush.bf16.msrb.mxu0 %v1347_v17  ;;  %1644 = vmatpush.bf16.msrb.mxu1 %v1379_v22  ;;  %v1375_v46 = vpack.c.bf16 %v1027_v39, %v1023_v37  ;;  %v807_v52 = vunpack.c.2.s8 %v535_v42  ;;  %v811_v53 = vunpack.c.3.s8 %v535_v42  ;;  %v2569_v55 = vcvt.s32.f32 %v743_v48  ;;  %v515_v22 = vld [vmem:[%s2467_s10 + $0x128] sm:$0xff] }
  0xef   : > { %v2571_v56 = vcvt.s32.f32 %v747_v49  ;;  %v879_v57 = vunpack.c.0.s8 %v555_v21  ;;  %v883_v61 = vunpack.c.1.s8 %v555_v21  ;;  %v943_v1 = vunpack.c.0.s8 %v571_v30 }
  0xf0   : > { %v2575_v59 = vcvt.s32.f32 %v807_v52  ;;  %v2577_v60 = vcvt.s32.f32 %v811_v53  ;;  %v947_v2 = vunpack.c.1.s8 %v571_v30  ;;  %v735_v8 = vunpack.c.0.s8 %v519_v35  ;;  %v531_v30 = vld [vmem:[%s2467_s10 + $0x1a8] sm:$0xff] }
  0xf1   : > { %v2581_v0 = vcvt.s32.f32 %v879_v57  ;;  %v2586_v7 = vcvt.s32.f32 %v883_v61  ;;  %v739_v10 = vunpack.c.1.s8 %v519_v35  ;;  %v2588_v11 = vcvt.s32.f32 %v943_v1  ;;  %v2663_v52 = vld [vmem:[%s2467_s10 + $0x188] sm:$0xff] }
  0xf2   : > { %1631 = vmatpush.bf16.msrb.mxu0 %v1343_v43  ;;  %1645 = vmatpush.bf16.msrb.mxu1 %v1375_v46  ;;  %v2590_v12 = vcvt.s32.f32 %v947_v2  ;;  %v799_v14 = vunpack.c.0.s8 %v535_v42  ;;  %v803_v15 = vunpack.c.1.s8 %v535_v42  ;;  %v2595_v19 = vcvt.s32.f32 %v735_v8 }
  0xf3   : > { %v2597_v20 = vcvt.s32.f32 %v739_v10  ;;  %v871_v21 = vunpack.c.2.s8 %v551_v3  ;;  %v875_v29 = vunpack.c.3.s8 %v551_v3  ;;  %v935_v34 = vunpack.c.2.s8 %v567_v16 }
  0xf4   : > { %v2602_v25 = vcvt.s32.f32 %v799_v14  ;;  %v2604_v28 = vcvt.s32.f32 %v803_v15  ;;  %v939_v35 = vunpack.c.3.s8 %v567_v16  ;;  %v727_v43 = vunpack.c.2.s8 %v515_v22 }
  0xf5   : > { %v2609_v33 = vcvt.s32.f32 %v871_v21  ;;  %v2613_v42 = vcvt.s32.f32 %v875_v29  ;;  %v731_v44 = vunpack.c.3.s8 %v515_v22  ;;  %v2615_v45 = vcvt.s32.f32 %v935_v34  ;;  %v2636_v34 = vld [vmem:[%s2467_s10 + $0x228] sm:$0xff] }
  0xf6   : > { %v2617_v46 = vcvt.s32.f32 %v939_v35  ;;  %v791_v48 = vunpack.c.2.s8 %v531_v30  ;;  %v795_v49 = vunpack.c.3.s8 %v531_v30  ;;  %v2621_v53 = vcvt.s32.f32 %v727_v43 }
  0xf7   : > { %v2623_v57 = vcvt.s32.f32 %v731_v44  ;;  %v863_v61 = vunpack.c.0.s8 %v551_v3  ;;  %v867_v10 = vunpack.c.1.s8 %v551_v3  ;;  %v927_v21 = vunpack.c.0.s8 %v567_v16 }
  0xf8   : > { %v2627_v2 = vcvt.s32.f32 %v791_v48  ;;  %v2629_v8 = vcvt.s32.f32 %v795_v49  ;;  %v931_v29 = vunpack.c.1.s8 %v567_v16  ;;  %v719_v44 = vunpack.c.0.s8 %v515_v22 }
  0xf9   : > { %v2633_v15 = vcvt.s32.f32 %v863_v61  ;;  %v2640_v43 = vcvt.s32.f32 %v867_v10  ;;  %v723_v48 = vunpack.c.1.s8 %v515_v22  ;;  %v2642_v49 = vcvt.s32.f32 %v927_v21  ;;  %v563_v22 = vld [vmem:[%s2467_s10 + $0x2a8] sm:$0xff] }
  0xfa   : > { %v2644_v3 = vcvt.s32.f32 %v931_v29  ;;  %v783_v14 = vunpack.c.0.s8 %v531_v30  ;;  %v787_v61 = vunpack.c.1.s8 %v531_v30  ;;  %v2648_v41 = vcvt.s32.f32 %v719_v44 }
  0xfb   : > { %v2650_v35 = vcvt.s32.f32 %v723_v48  ;;  %v855_v10 = vunpack.c.2.s8 %v2636_v34  ;;  %v859_v17 = vunpack.c.3.s8 %v2636_v34  ;;  %v923_v54 = vunpack.c.3.s8 %v563_v22 }
  0xfc   : > { %v2656_v24 = vcvt.s32.f32 %v783_v14  ;;  %v2658_v30 = vcvt.s32.f32 %v787_v61  ;;  %v919_v61 = vunpack.c.2.s8 %v563_v22  ;;  %v847_v62 = vunpack.c.0.s8 %v2636_v34 }
  0xfd   : > { %v2671_v58 = vcvt.s32.f32 %v855_v10  ;;  %v2675_v29 = vcvt.s32.f32 %v859_v17  ;;  %v2691_v14 = vcvt.s32.f32 %v923_v54  ;;  %v851_v6 = vunpack.c.1.s8 %v2636_v34  ;;  %v492_v17 = vld [vmem:[%s2467_s10 + $0x70] sm:$0xff] }
  0xfe   : > { %v2689_v10 = vcvt.s32.f32 %v919_v61  ;;  %v3199_v34 = vpack.c.bf16 %v2550_v27, %v2548_v26  ;;  %v771_v26 = vunpack.c.1.s8 %v2663_v52  ;;  %v632_v27 = vunpack.c.2.s8 %v492_v17 }
  0xff   : > { %3195 = vst [vmem:[#allocation11_spill] sm:$0xff] %v2671_v58 }
 0x131   : > { %v403_v37 = vpop.f32.mrf.mxu0  ;;  %v417_v39 = vpop.f32.mrf.mxu1 }
 0x138   : > { %v431_v1 = vpop.f32.mrf.mxu2  ;;  %v445_v16 = vpop.f32.mrf.mxu3 }
 0x139   : > { %v405_v21 = vpop.f32.mrf.mxu0  ;;  %v419_v32 = vpop.f32.mrf.mxu1 }
 0x13a   : > { %v2665_v44 = vpack.c.bf16 %v405_v21, %v403_v37  ;;  %v2667_v48 = vpack.c.bf16 %v419_v32, %v417_v39  ;;  %v711_v37 = vunpack.c.2.s8 %v511_v4  ;;  %v715_v21 = vunpack.c.3.s8 %v511_v4 }
 0x13b   : > { %v775_v32 = vunpack.c.2.s8 %v2663_v52  ;;  %v779_v39 = vunpack.c.3.s8 %v2663_v52 }
 0x13c   : > { %1548 = vmatmul.bf16.vlgmr.msrb.gmra.mxu2 %v2665_v44  ;;  %1562 = vmatmul.bf16.vlgmr.msrb.gmra.mxu3 %v2667_v48  ;;  %v2694_v36 = vcvt.s32.f32 %v711_v37  ;;  %v2696_v31 = vcvt.s32.f32 %v715_v21  ;;  %v2727_v21 = vld [vmem:[%s2467_s10 + $0xf0] sm:$0xff] }
 0x13d   : > { %1652 = vmatpush.bf16.msrb.mxu2 %v1435_v9  ;;  %1666 = vmatpush.bf16.msrb.mxu3 %v1467_v13  ;;  %v2698_v63 = vcvt.s32.f32 %v775_v32  ;;  %v2700_v38 = vcvt.s32.f32 %v779_v39  ;;  %v2705_v9 = vcvt.s32.f32 %v847_v62  ;;  %v911_v13 = vunpack.c.0.s8 %v563_v22 }
 0x13e   : > { %3196 = vst [vmem:[#allocation12_spill] sm:$0xff] %v2694_v36  ;;  %v915_v32 = vunpack.c.1.s8 %v563_v22  ;;  %v703_v39 = vunpack.c.0.s8 %v511_v4  ;;  %v3198_v62 = vpack.c.bf16 %v2546_v23, %v2543_v18  ;;  %v767_v18 = vunpack.c.0.s8 %v2663_v52 }
 0x13f   : > { %3197 = vst [vmem:[#allocation13_spill] sm:$0xff] %v2696_v31  ;;  %v2722_v31 = vcvt.s32.f32 %v851_v6  ;;  %v2724_v22 = vcvt.s32.f32 %v911_v13  ;;  %v636_v6 = vunpack.c.3.s8 %v492_v17  ;;  %v543_v13 = vld [vmem:[%s2467_s10 + $0x208] sm:$0xff]  ;;  %v696_v52 = vunpack.c.2.s8 %v2727_v21 }
 0x140   : > { %v433_v54 = vpop.f32.mrf.mxu2  ;;  %v447_v61 = vpop.f32.mrf.mxu3  ;;  %v3202_v23 = vpack.c.bf16 %v2571_v56, %v2569_v55  ;;  %v843_v55 = vunpack.c.3.s8 %v543_v13  ;;  %v624_v56 = vunpack.c.0.s8 %v492_v17 }
 0x141   : > { %v2712_v58 = vpack.c.bf16 %v433_v54, %v431_v1  ;;  %v2714_v5 = vpack.c.bf16 %v447_v61, %v445_v16  ;;  %1653 = vmatpush.bf16.msrb.mxu2 %v3198_v62  ;;  %1667 = vmatpush.bf16.msrb.mxu3 %v3199_v34  ;;  %v459_v37 = vpop.f32.mrf.mxu0  ;;  %v473_v36 = vpop.f32.mrf.mxu1  ;;  %v2729_v1 = vcvt.s32.f32 %v915_v32  ;;  %v707_v16 = vunpack.c.1.s8 %v511_v4  ;;  %v559_v34 = vld [vmem:[%s2467_s10 + $0x288] sm:$0xff] }
 0x142   : > { %v2731_v54 = vcvt.s32.f32 %v703_v39  ;;  %v3200_v4 = vpack.c.bf16 %v2561_v47, %v2559_v40  ;;  %v3201_v61 = vpack.c.bf16 %v2565_v51, %v2563_v50  ;;  %v2750_v62 = vcvt.s32.f32 %v767_v18 }
 0x143   : > { %1576 = vmatmul.bf16.vlgmr.msra.gmra.mxu0 %v2712_v58  ;;  %1590 = vmatmul.bf16.vlgmr.msra.gmra.mxu1 %v2714_v5  ;;  %v1511_v32 = vpack.c.bf16 %v2729_v1, %v2724_v22  ;;  %v2748_v39 = vcvt.s32.f32 %v707_v16  ;;  %v3203_v40 = vpack.c.bf16 %v2577_v60, %v2575_v59  ;;  %v2760_v47 = vcvt.s32.f32 %v771_v26 }
 0x144   : > { %1680 = vmatpush.bf16.msra.mxu0 %v3200_v4  ;;  %1694 = vmatpush.bf16.msra.mxu1 %v3201_v61  ;;  %v2762_v50 = vcvt.s32.f32 %v632_v27  ;;  %v2764_v51 = vcvt.s32.f32 %v636_v6  ;;  %v700_v16 = vunpack.c.3.s8 %v2727_v21  ;;  %v2769_v4 = vcvt.s32.f32 %v696_v52 }
 0x145   : > { %1654 = vmatpush.bf16.msrb.mxu2 %v3202_v23  ;;  %1668 = vmatpush.bf16.msrb.mxu3 %v3203_v40  ;;  %v1407_v18 = vpack.c.bf16 %v2748_v39, %v2731_v54  ;;  %v839_v61 = vunpack.c.2.s8 %v543_v13  ;;  %v903_v23 = vunpack.c.2.s8 %v559_v34  ;;  %v3204_v26 = vpack.c.bf16 %v2586_v7, %v2581_v0 }
 0x146   : > { %v2775_v60 = vcvt.s32.f32 %v700_v16  ;;  %v3205_v27 = vpack.c.bf16 %v2590_v12, %v2588_v11  ;;  %v2785_v52 = vcvt.s32.f32 %v843_v55  ;;  %v907_v40 = vunpack.c.3.s8 %v559_v34 }
 0x147   : > { %v2783_v6 = vcvt.s32.f32 %v839_v61  ;;  %v3206_v16 = vpack.c.bf16 %v2597_v20, %v2595_v19  ;;  %v3207_v59 = vpack.c.bf16 %v2604_v28, %v2602_v25  ;;  %v2795_v12 = vcvt.s32.f32 %v903_v23  ;;  %v524_v25 = vld [vmem:[%s2467_s10 + $0x170] sm:$0xff] }
 0x148   : > { %1681 = vmatpush.bf16.msra.mxu0 %v3204_v26  ;;  %1695 = vmatpush.bf16.msra.mxu1 %v3205_v27  ;;  %v1404_v11 = vpack.c.bf16 %v2775_v60, %v2769_v4  ;;  %v628_v61 = vunpack.c.1.s8 %v492_v17  ;;  %v688_v55 = vunpack.c.0.s8 %v2727_v21  ;;  %v2804_v20 = vcvt.s32.f32 %v907_v40 }
 0x149   : > { %1655 = vmatpush.bf16.msrb.mxu2 %v3206_v16  ;;  %1669 = vmatpush.bf16.msrb.mxu3 %v3207_v59  ;;  %v461_v0 = vpop.f32.mrf.mxu0  ;;  %v475_v7 = vpop.f32.mrf.mxu1  ;;  %v2807_v28 = vcvt.s32.f32 %v624_v56  ;;  %v692_v17 = vunpack.c.1.s8 %v2727_v21  ;;  %v831_v56 = vunpack.c.0.s8 %v543_v13  ;;  %v835_v16 = vunpack.c.1.s8 %v543_v13 }
 0x14a   : > { %v2798_v26 = vpack.c.bf16 %v461_v0, %v459_v37  ;;  %v2800_v27 = vpack.c.bf16 %v475_v7, %v473_v36  ;;  %v2809_v59 = vcvt.s32.f32 %v628_v61  ;;  %v2812_v23 = vcvt.s32.f32 %v688_v55  ;;  %v540_v7 = vld [vmem:[%s2467_s10 + $0x1f0] sm:$0xff] }
 0x14b   : > { %v3208_v37 = vpack.c.bf16 %v2613_v42, %v2609_v33  ;;  %v3209_v36 = vpack.c.bf16 %v2617_v46, %v2615_v45  ;;  %v895_v0 = vunpack.c.0.s8 %v559_v34  ;;  %v2827_v42 = vcvt.s32.f32 %v692_v17  ;;  %v488_v46 = vld [vmem:[%s2467_s10 + $0x50] sm:$0xff] }
 0x14c   : > { %1604 = vmatmul.bf16.vlgmr.msra.gmra.mxu2 %v2798_v26  ;;  %1618 = vmatmul.bf16.vlgmr.msra.gmra.mxu3 %v2800_v27  ;;  %v899_v21 = vunpack.c.1.s8 %v559_v34  ;;  %v760_v45 = vunpack.c.2.s8 %v524_v25  ;;  %v3210_v61 = vpack.c.bf16 %v2623_v57, %v2621_v53  ;;  %v3211_v13 = vpack.c.bf16 %v2629_v8, %v2627_v2  ;;  %v504_v17 = vld [vmem:[%s2467_s10 + $0xd0] sm:$0xff] }
 0x14d   : > { %1682 = vmatpush.bf16.msra.mxu0 %v3208_v37  ;;  %1696 = vmatpush.bf16.msra.mxu1 %v3209_v36  ;;  %v2836_v55 = vcvt.s32.f32 %v831_v56  ;;  %v2838_v37 = vcvt.s32.f32 %v835_v16  ;;  %v2840_v36 = vcvt.s32.f32 %v895_v0  ;;  %v764_v33 = vunpack.c.3.s8 %v524_v25 }
 0x14e   : > { %1656 = vmatpush.bf16.msrb.mxu2 %v3210_v61  ;;  %1670 = vmatpush.bf16.msrb.mxu3 %v3211_v13  ;;  %v1400_v34 = vpack.c.bf16 %v2827_v42, %v2812_v23  ;;  %v2845_v40 = vcvt.s32.f32 %v899_v21  ;;  %v2847_v19 = vcvt.s32.f32 %v760_v45  ;;  %v824_v53 = vunpack.c.2.s8 %v540_v7 }
 0x14f   : > { %v3212_v57 = vpack.c.bf16 %v2640_v43, %v2633_v15  ;;  %v3213_v2 = vpack.c.bf16 %v2644_v3, %v2642_v49  ;;  %v1471_v8 = vpack.c.bf16 %v2838_v37, %v2836_v55  ;;  %v2857_v56 = vcvt.s32.f32 %v764_v33 }
 0x150   : > { %v828_v16 = vunpack.c.3.s8 %v540_v7  ;;  %v616_v0 = vunpack.c.2.s8 %v488_v46  ;;  %v2861_v45 = vcvt.s32.f32 %v824_v53  ;;  %v620_v61 = vunpack.c.3.s8 %v488_v46 }
 0x151   : > { %1683 = vmatpush.bf16.msra.mxu0 %v3212_v57  ;;  %1697 = vmatpush.bf16.msra.mxu1 %v3213_v2  ;;  %v680_v13 = vunpack.c.2.s8 %v504_v17  ;;  %v3214_v15 = vpack.c.bf16 %v2650_v35, %v2648_v41  ;;  %v3215_v43 = vpack.c.bf16 %v2658_v30, %v2656_v24  ;;  %v684_v57 = vunpack.c.3.s8 %v504_v17  ;;  %v3216_v30 = vld [vmem:[#allocation11_spill] sm:$0xff] }
 0x152   : > { %v2871_v3 = vcvt.s32.f32 %v828_v16  ;;  %v2873_v33 = vcvt.s32.f32 %v616_v0  ;;  %v2877_v53 = vcvt.s32.f32 %v620_v61  ;;  %v752_v35 = vunpack.c.0.s8 %v524_v25 }
 0x153   : > { %1657 = vmatpush.bf16.msrb.mxu2 %v3214_v15  ;;  %1671 = vmatpush.bf16.msrb.mxu3 %v3215_v43  ;;  %v2879_v41 = vcvt.s32.f32 %v680_v13  ;;  %v756_v24 = vunpack.c.1.s8 %v524_v25  ;;  %v3217_v2 = vpack.c.bf16 %v2675_v29, %v3216_v30  ;;  %v3218_v16 = vpack.c.bf16 %v2691_v14, %v2689_v10  ;;  %v3219_v14 = vld [vmem:[#allocation13_spill] sm:$0xff]  ;;  %v3220_v10 = vld [vmem:[#allocation12_spill] sm:$0xff] }
 0x154   : > { %1632 = vmatmul.bf16.vlgmr.msrb.gmra.mxu0 %v2665_v44  ;;  %1646 = vmatmul.bf16.vlgmr.msrb.gmra.mxu1 %v2667_v48  ;;  %v2889_v15 = vcvt.s32.f32 %v684_v57  ;;  %v816_v61 = vunpack.c.0.s8 %v540_v7  ;;  %v820_v43 = vunpack.c.1.s8 %v540_v7  ;;  %v2893_v25 = vcvt.s32.f32 %v752_v35  ;;  %v500_v7 = vld [vmem:[%s2467_s10 + $0xb0] sm:$0xff] }
 0x155   : > { %1684 = vmatpush.bf16.msra.mxu0 %v3217_v2  ;;  %1698 = vmatpush.bf16.msra.mxu1 %v3218_v16  ;;  %v2895_v29 = vcvt.s32.f32 %v756_v24  ;;  %v608_v30 = vunpack.c.0.s8 %v488_v46  ;;  %v520_v2 = vld [vmem:[%s2467_s10 + $0x150] sm:$0xff]  ;;  %v3221_v16 = vpack.c.bf16 %v3219_v14, %v3220_v10  ;;  %v3222_v57 = vpack.c.bf16 %v2700_v38, %v2698_v63 }
 0x156   : > { %v2906_v0 = vcvt.s32.f32 %v816_v61  ;;  %v2908_v13 = vcvt.s32.f32 %v820_v43  ;;  %v612_v35 = vunpack.c.1.s8 %v488_v46  ;;  %v536_v24 = vld [vmem:[%s2467_s10 + $0x1d0] sm:$0xff]  ;;  %v672_v14 = vunpack.c.0.s8 %v504_v17 }
 0x157   : > { %1658 = vmatpush.bf16.msrb.mxu2 %v3221_v16  ;;  %1672 = vmatpush.bf16.msrb.mxu3 %v3222_v57  ;;  %v2913_v21 = vcvt.s32.f32 %v608_v30  ;;  %v676_v10 = vunpack.c.1.s8 %v504_v17  ;;  %v484_v16 = vld [vmem:[%s2467_s10 + $0x30] sm:$0xff]  ;;  %v3223_v63 = vpack.c.bf16 %v2722_v31, %v2705_v9  ;;  %v744_v61 = vunpack.c.2.s8 %v520_v2 }
 0x158   : > { %v1464_v38 = vpack.c.bf16 %v2908_v13, %v2906_v0  ;;  %v2924_v46 = vcvt.s32.f32 %v612_v35  ;;  %v748_v43 = vunpack.c.3.s8 %v520_v2  ;;  %v2926_v30 = vcvt.s32.f32 %v672_v14 }
 0x159   : > { %1685 = vmatpush.bf16.msra.mxu0 %v3223_v63  ;;  %1699 = vmatpush.bf16.msra.mxu1 %v1511_v32  ;;  %v2928_v57 = vcvt.s32.f32 %v676_v10  ;;  %v808_v17 = vunpack.c.2.s8 %v536_v24  ;;  %v812_v49 = vunpack.c.3.s8 %v536_v24  ;;  %v3224_v31 = vpack.c.bf16 %v2760_v47, %v2750_v62 }
 0x15a   : > { %v1360_v9 = vpack.c.bf16 %v2924_v46, %v2913_v21  ;;  %v2939_v22 = vcvt.s32.f32 %v744_v61  ;;  %v2941_v1 = vcvt.s32.f32 %v748_v43  ;;  %v600_v32 = vunpack.c.2.s8 %v484_v16 }
 0x15b   : > { %1659 = vmatpush.bf16.msrb.mxu2 %v1407_v18  ;;  %1673 = vmatpush.bf16.msrb.mxu3 %v3224_v31  ;;  %v3225_v35 = vpack.c.bf16 %v2764_v51, %v2762_v50  ;;  %v1392_v54 = vpack.c.bf16 %v2928_v57, %v2926_v30  ;;  %v2951_v39 = vcvt.s32.f32 %v808_v17  ;;  %v2953_v62 = vcvt.s32.f32 %v812_v49 }
 0x15c   : > { %v604_v47 = vunpack.c.3.s8 %v484_v16  ;;  %v3226_v18 = vpack.c.bf16 %v2785_v52, %v2783_v6  ;;  %v3227_v50 = vpack.c.bf16 %v2804_v20, %v2795_v12  ;;  %v1428_v51 = vpack.c.bf16 %v2941_v1, %v2939_v22 }
 0x15d   : > { %v2963_v4 = vcvt.s32.f32 %v600_v32  ;;  %v664_v60 = vunpack.c.2.s8 %v500_v7  ;;  %v1460_v6 = vpack.c.bf16 %v2953_v62, %v2951_v39  ;;  %v736_v49 = vunpack.c.0.s8 %v520_v2  ;;  %v516_v32 = vld [vmem:[%s2467_s10 + $0x130] sm:$0xff] }
 0x15e   : > { %1686 = vmatpush.bf16.msra.mxu0 %v3226_v18  ;;  %1700 = vmatpush.bf16.msra.mxu1 %v3227_v50  ;;  %v2969_v52 = vcvt.s32.f32 %v604_v47  ;;  %v740_v12 = vunpack.c.1.s8 %v520_v2  ;;  %v800_v10 = vunpack.c.0.s8 %v536_v24  ;;  %v804_v63 = vunpack.c.1.s8 %v536_v24  ;;  %v532_v24 = vld [vmem:[%s2467_s10 + $0x1b0] sm:$0xff] }
 0x15f   : > { %1708 = vmatpush.bf16.msra.mxu2 %v3225_v35  ;;  %1722 = vmatpush.bf16.msra.mxu3 %v1404_v11  ;;  %v668_v11 = vunpack.c.3.s8 %v500_v7  ;;  %v2971_v20 = vcvt.s32.f32 %v664_v60  ;;  %v3228_v61 = vpack.c.bf16 %v2809_v59, %v2807_v28  ;;  %v2983_v17 = vcvt.s32.f32 %v736_v49  ;;  %v480_v47 = vld [vmem:[%s2467_s10 + $0x10] sm:$0xff] }
 0x160   : > { %1660 = vmatmul.bf16.vlgmr.msrb.gmra.mxu2 %v2712_v58  ;;  %1674 = vmatmul.bf16.vlgmr.msrb.gmra.mxu3 %v2714_v5  ;;  %v1356_v43 = vpack.c.bf16 %v2969_v52, %v2963_v4  ;;  %v2985_v2 = vcvt.s32.f32 %v740_v12  ;;  %v592_v31 = vunpack.c.0.s8 %v484_v16  ;;  %v3229_v28 = vpack.c.bf16 %v2845_v40, %v2840_v36  ;;  %v496_v49 = vld [vmem:[%s2467_s10 + $0x90] sm:$0xff] }
 0x161   : > { %v2973_v14 = vcvt.s32.f32 %v668_v11  ;;  %v2996_v23 = vcvt.s32.f32 %v800_v10  ;;  %v2998_v42 = vcvt.s32.f32 %v804_v63  ;;  %v3230_v35 = vpack.c.bf16 %v2857_v56, %v2847_v19 }
 0x162   : > { %1687 = vmatpush.bf16.msra.mxu0 %v1471_v8  ;;  %1701 = vmatpush.bf16.msra.mxu1 %v3229_v28  ;;  %v3231_v55 = vpack.c.bf16 %v2871_v3, %v2861_v45  ;;  %v1424_v40 = vpack.c.bf16 %v2985_v2, %v2983_v17  ;;  %v3009_v37 = vcvt.s32.f32 %v592_v31  ;;  %v656_v36 = vunpack.c.0.s8 %v500_v7 }
 0x163   : > { %1709 = vmatpush.bf16.msra.mxu2 %v3228_v61  ;;  %1723 = vmatpush.bf16.msra.mxu3 %v1400_v34  ;;  %v1388_v59 = vpack.c.bf16 %v2973_v14, %v2971_v20  ;;  %v596_v34 = vunpack.c.1.s8 %v484_v16  ;;  %v660_v8 = vunpack.c.1.s8 %v500_v7  ;;  %v1456_v16 = vpack.c.bf16 %v2998_v42, %v2996_v23 }
 0x164   : > { %v728_v19 = vunpack.c.2.s8 %v516_v32  ;;  %v732_v56 = vunpack.c.3.s8 %v516_v32  ;;  %v3232_v45 = vpack.c.bf16 %v2877_v53, %v2873_v33  ;;  %v3233_v3 = vpack.c.bf16 %v2889_v15, %v2879_v41 }
 0x165   : > { %v3014_v18 = vcvt.s32.f32 %v596_v34  ;;  %v3022_v50 = vcvt.s32.f32 %v656_v36  ;;  %v3024_v60 = vcvt.s32.f32 %v660_v8  ;;  %v792_v7 = vunpack.c.2.s8 %v532_v24  ;;  %1688 = vmatmul.bf16.vlgmr.msra.gmra.mxu0 %v2798_v26  ;;  %1702 = vmatmul.bf16.vlgmr.msra.gmra.mxu1 %v2800_v27 }
 0x166   : > { %1736 = vmatpush.bf16.msrb.mxu0 %v3230_v35  ;;  %1750 = vmatpush.bf16.msrb.mxu1 %v3231_v55  ;;  %v796_v11 = vunpack.c.3.s8 %v532_v24  ;;  %v3031_v33 = vcvt.s32.f32 %v728_v19  ;;  %v3033_v53 = vcvt.s32.f32 %v732_v56  ;;  %v584_v41 = vunpack.c.2.s8 %v480_v47 }
 0x167   : > { %1710 = vmatpush.bf16.msra.mxu2 %v3232_v45  ;;  %1724 = vmatpush.bf16.msra.mxu3 %v3233_v3  ;;  %v1352_v12 = vpack.c.bf16 %v3014_v18, %v3009_v37  ;;  %v3234_v15 = vpack.c.bf16 %v2895_v29, %v2893_v25  ;;  %v1384_v20 = vpack.c.bf16 %v3024_v60, %v3022_v50  ;;  %v1176_v14 = vcvt.s32.f32 %v792_v7  ;;  %v572_v37 = vld [vmem:[%s2467_s10 + $0x2f0] sm:$0xff] }
 0x168   : > { %v1180_v10 = vcvt.s32.f32 %v796_v11  ;;  %v588_v63 = vunpack.c.3.s8 %v480_v47  ;;  %v1420_v61 = vpack.c.bf16 %v3033_v53, %v3031_v33  ;;  %v3045_v31 = vcvt.s32.f32 %v584_v41 }
 0x169   : > { %v648_v28 = vunpack.c.2.s8 %v496_v49  ;;  %v652_v23 = vunpack.c.3.s8 %v496_v49  ;;  %v720_v25 = vunpack.c.0.s8 %v516_v32  ;;  %v724_v29 = vunpack.c.1.s8 %v516_v32 }
 0x16a   : > { %1737 = vmatpush.bf16.msrb.mxu0 %v3234_v15  ;;  %1751 = vmatpush.bf16.msrb.mxu1 %v1464_v38  ;;  %v1452_v0 = vpack.c.bf16 %v1180_v10, %v1176_v14  ;;  %v972_v13 = vcvt.s32.f32 %v588_v63  ;;  %v784_v34 = vunpack.c.0.s8 %v532_v24  ;;  %v788_v35 = vunpack.c.1.s8 %v532_v24 }
 0x16b   : > { %1711 = vmatpush.bf16.msra.mxu2 %v1360_v9  ;;  %1725 = vmatpush.bf16.msra.mxu3 %v1392_v54  ;;  %v1032_v38 = vcvt.s32.f32 %v648_v28  ;;  %v1036_v42 = vcvt.s32.f32 %v652_v23  ;;  %v3060_v46 = vcvt.s32.f32 %v720_v25  ;;  %v1108_v30 = vcvt.s32.f32 %v724_v29  ;;  %v556_v9 = vld [vmem:[%s2467_s10 + $0x270] sm:$0xff]  ;;  %v493_v23 = vld [vmem:[%s2467_s10 + $0x78] sm:$0xff] }
 0x16c   : > { %v1348_v21 = vpack.c.bf16 %v972_v13, %v3045_v31  ;;  %v576_v57 = vunpack.c.0.s8 %v480_v47  ;;  %v1168_v32 = vcvt.s32.f32 %v784_v34  ;;  %v1172_v55 = vcvt.s32.f32 %v788_v35  ;;  %v509_v29 = vld [vmem:[%s2467_s10 + $0xf8] sm:$0xff] }
 0x16d   : > { %v1380_v54 = vpack.c.bf16 %v1036_v42, %v1032_v38  ;;  %v580_v24 = vunpack.c.1.s8 %v480_v47  ;;  %v1416_v22 = vpack.c.bf16 %v1108_v30, %v3060_v46  ;;  %v640_v39 = vunpack.c.0.s8 %v496_v49 }
 0x16e   : > { %1738 = vmatpush.bf16.msrb.mxu0 %v1428_v51  ;;  %1752 = vmatpush.bf16.msrb.mxu1 %v1460_v6  ;;  %v960_v1 = vcvt.s32.f32 %v576_v57  ;;  %v644_v62 = vunpack.c.1.s8 %v496_v49  ;;  %v512_v51 = vld [vmem:[%s2467_s10 + $0x110] sm:$0xff]  ;;  %v1448_v6 = vpack.c.bf16 %v1172_v55, %v1168_v32  ;;  %v888_v8 = vunpack.c.2.s8 %v556_v9 }
 0x16f   : > { %1712 = vmatpush.bf16.msra.mxu2 %v1356_v43  ;;  %1726 = vmatpush.bf16.msra.mxu3 %v1388_v59  ;;  %v964_v36 = vcvt.s32.f32 %v580_v24  ;;  %v892_v18 = vunpack.c.3.s8 %v556_v9  ;;  %v1024_v47 = vcvt.s32.f32 %v640_v39  ;;  %v952_v52 = vunpack.c.2.s8 %v572_v37  ;;  %v528_v59 = vld [vmem:[%s2467_s10 + $0x190] sm:$0xff] }
 0x170   : > { %v1028_v4 = vcvt.s32.f32 %v644_v62  ;;  %v956_v43 = vunpack.c.3.s8 %v572_v37  ;;  %v1272_v56 = vcvt.s32.f32 %v888_v8  ;;  %v712_v3 = vunpack.c.2.s8 %v512_v51 }
 0x171   : > { %v1344_v19 = vpack.c.bf16 %v964_v36, %v960_v1  ;;  %v1276_v45 = vcvt.s32.f32 %v892_v18  ;;  %v1336_v60 = vcvt.s32.f32 %v952_v52  ;;  %v716_v11 = vunpack.c.3.s8 %v512_v51 }
 0x172   : > { %1739 = vmatpush.bf16.msrb.mxu0 %v1424_v40  ;;  %1753 = vmatpush.bf16.msrb.mxu1 %v1456_v16  ;;  %v1376_v50 = vpack.c.bf16 %v1028_v4, %v1024_v47  ;;  %v1340_v7 = vcvt.s32.f32 %v956_v43  ;;  %v1096_v33 = vcvt.s32.f32 %v712_v3  ;;  %v776_v17 = vunpack.c.2.s8 %v528_v59 }
 0x173   : > { %1713 = vmatpush.bf16.msra.mxu2 %v1352_v12  ;;  %1727 = vmatpush.bf16.msra.mxu3 %v1384_v20  ;;  %v1500_v49 = vpack.c.bf16 %v1276_v45, %v1272_v56  ;;  %v780_v2 = vunpack.c.3.s8 %v528_v59  ;;  %v1100_v16 = vcvt.s32.f32 %v716_v11  ;;  %v880_v53 = vunpack.c.0.s8 %v556_v9 }
 0x174   : > { %v1532_v40 = vpack.c.bf16 %v1340_v7, %v1336_v60  ;;  %v884_v41 = vunpack.c.1.s8 %v556_v9  ;;  %v1160_v15 = vcvt.s32.f32 %v776_v17  ;;  %v944_v12 = vunpack.c.0.s8 %v572_v37  ;;  %v489_v17 = vld [vmem:[%s2467_s10 + $0x58] sm:$0xff] }
 0x175   : > { %v1164_v14 = vcvt.s32.f32 %v780_v2  ;;  %v948_v20 = vunpack.c.1.s8 %v572_v37  ;;  %v1412_v10 = vpack.c.bf16 %v1100_v16, %v1096_v33  ;;  %v1264_v63 = vcvt.s32.f32 %v880_v53  ;;  %v568_v37 = vld [vmem:[%s2467_s10 + $0x2d0] sm:$0xff] }
 0x176   : > { %1740 = vmatpush.bf16.msrb.mxu0 %v1420_v61  ;;  %1754 = vmatpush.bf16.msrb.mxu1 %v1452_v0  ;;  %v1268_v31 = vcvt.s32.f32 %v884_v41  ;;  %v704_v28 = vunpack.c.0.s8 %v512_v51  ;;  %v1328_v13 = vcvt.s32.f32 %v944_v12  ;;  %v708_v25 = vunpack.c.1.s8 %v512_v51  ;;  %v505_v41 = vld [vmem:[%s2467_s10 + $0xd8] sm:$0xff] }
 0x177   : > { %1714 = vmatpush.bf16.msra.mxu2 %v1348_v21  ;;  %1728 = vmatpush.bf16.msra.mxu3 %v1380_v54  ;;  %v1444_v61 = vpack.c.bf16 %v1164_v14, %v1160_v15  ;;  %v1332_v0 = vcvt.s32.f32 %v948_v20  ;;  %v768_v34 = vunpack.c.0.s8 %v528_v59  ;;  %v772_v35 = vunpack.c.1.s8 %v528_v59  ;;  %v552_v21 = vld [vmem:[%s2467_s10 + $0x250] sm:$0xff] }
 0x178   : > { %v1496_v38 = vpack.c.bf16 %v1268_v31, %v1264_v63  ;;  %v1088_v42 = vcvt.s32.f32 %v704_v28  ;;  %v1092_v30 = vcvt.s32.f32 %v708_v25  ;;  %v633_v57 = vunpack.c.2.s8 %v493_v23 }
 0x179   : > { %v1528_v46 = vpack.c.bf16 %v1332_v0, %v1328_v13  ;;  %v637_v9 = vunpack.c.3.s8 %v493_v23  ;;  %v1152_v54 = vcvt.s32.f32 %v768_v34  ;;  %v1156_v32 = vcvt.s32.f32 %v772_v35 }
 0x17a   : > { %1741 = vmatpush.bf16.msrb.mxu0 %v1416_v22  ;;  %1755 = vmatpush.bf16.msrb.mxu1 %v1448_v6  ;;  %v697_v55 = vunpack.c.2.s8 %v509_v29  ;;  %v701_v24 = vunpack.c.3.s8 %v509_v29  ;;  %v1408_v22 = vpack.c.bf16 %v1092_v30, %v1088_v42  ;;  %v1017_v1 = vcvt.s32.f32 %v633_v57 }
 0x17b   : > { %1715 = vmatpush.bf16.msra.mxu2 %v1344_v19  ;;  %1729 = vmatpush.bf16.msra.mxu3 %v1376_v50  ;;  %v1021_v39 = vcvt.s32.f32 %v637_v9  ;;  %v872_v62 = vunpack.c.2.s8 %v552_v21  ;;  %v1440_v51 = vpack.c.bf16 %v1156_v32, %v1152_v54  ;;  %v876_v8 = vunpack.c.3.s8 %v552_v21 }
 0x17c   : > { %v1081_v6 = vcvt.s32.f32 %v697_v55  ;;  %v1085_v36 = vcvt.s32.f32 %v701_v24  ;;  %v936_v4 = vunpack.c.2.s8 %v568_v37  ;;  %v940_v52 = vunpack.c.3.s8 %v568_v37 }
 0x17d   : > { %v1373_v18 = vpack.c.bf16 %v1021_v39, %v1017_v1  ;;  %v1256_v47 = vcvt.s32.f32 %v872_v62  ;;  %v1260_v59 = vcvt.s32.f32 %v876_v8  ;;  %v625_v19 = vunpack.c.0.s8 %v493_v23 }
 0x17e   : > { %1742 = vmatpush.bf16.msrb.mxu0 %v1412_v10  ;;  %1756 = vmatpush.bf16.msrb.mxu1 %v1444_v61  ;;  %v1405_v43 = vpack.c.bf16 %v1085_v36, %v1081_v6  ;;  %v629_v56 = vunpack.c.1.s8 %v493_v23  ;;  %v1320_v45 = vcvt.s32.f32 %v936_v4  ;;  %v1324_v3 = vcvt.s32.f32 %v940_v52  ;;  %v548_v10 = vld [vmem:[%s2467_s10 + $0x230] sm:$0xff]  ;;  %v485_v4 = vld [vmem:[%s2467_s10 + $0x38] sm:$0xff] }
 0x17f   : > { %1764 = vmatpush.bf16.msrb.mxu2 %v1500_v49  ;;  %1778 = vmatpush.bf16.msrb.mxu3 %v1532_v40  ;;  %v689_v50 = vunpack.c.0.s8 %v509_v29  ;;  %v693_v60 = vunpack.c.1.s8 %v509_v29  ;;  %v1492_v7 = vpack.c.bf16 %v1260_v59, %v1256_v47  ;;  %v1009_v11 = vcvt.s32.f32 %v625_v19  ;;  %v564_v29 = vld [vmem:[%s2467_s10 + $0x2b0] sm:$0xff] }
 0x180   : > { %1716 = vmatmul.bf16.vlgmr.msra.gmra.mxu2 %v2665_v44  ;;  %1730 = vmatmul.bf16.vlgmr.msra.gmra.mxu3 %v2667_v48  ;;  %v1013_v49 = vcvt.s32.f32 %v629_v56  ;;  %v864_v33 = vunpack.c.0.s8 %v552_v21  ;;  %v1524_v2 = vpack.c.bf16 %v1324_v3, %v1320_v45  ;;  %v868_v53 = vunpack.c.1.s8 %v552_v21  ;;  %v501_v56 = vld [vmem:[%s2467_s10 + $0xb8] sm:$0xff] }
 0x181   : > { %v1073_v40 = vcvt.s32.f32 %v689_v50  ;;  %v1077_v16 = vcvt.s32.f32 %v693_v60  ;;  %v928_v12 = vunpack.c.0.s8 %v568_v37  ;;  %v932_v20 = vunpack.c.1.s8 %v568_v37 }
 0x182   : > { %1743 = vmatpush.bf16.msrb.mxu0 %v1408_v22  ;;  %1757 = vmatpush.bf16.msrb.mxu1 %v1440_v51  ;;  %v1369_v15 = vpack.c.bf16 %v1013_v49, %v1009_v11  ;;  %v1248_v14 = vcvt.s32.f32 %v864_v33  ;;  %v1252_v31 = vcvt.s32.f32 %v868_v53  ;;  %v617_v28 = vunpack.c.2.s8 %v489_v17 }
 0x183   : > { %1765 = vmatpush.bf16.msrb.mxu2 %v1496_v38  ;;  %1779 = vmatpush.bf16.msrb.mxu3 %v1528_v46  ;;  %v1401_v63 = vpack.c.bf16 %v1077_v16, %v1073_v40  ;;  %v621_v23 = vunpack.c.3.s8 %v489_v17  ;;  %v1312_v61 = vcvt.s32.f32 %v928_v12  ;;  %v1316_v13 = vcvt.s32.f32 %v932_v20 }
 0x184   : > { %v681_v0 = vunpack.c.2.s8 %v505_v41  ;;  %v685_v25 = vunpack.c.3.s8 %v505_v41  ;;  %v1488_v38 = vpack.c.bf16 %v1252_v31, %v1248_v14  ;;  %v1001_v42 = vcvt.s32.f32 %v617_v28 }
 0x185   : > { %1744 = vmatmul.bf16.vlgmr.msrb.gmra.mxu0 %v2712_v58  ;;  %1758 = vmatmul.bf16.vlgmr.msrb.gmra.mxu1 %v2714_v5  ;;  %v1005_v34 = vcvt.s32.f32 %v621_v23  ;;  %v856_v35 = vunpack.c.2.s8 %v548_v10  ;;  %v1520_v21 = vpack.c.bf16 %v1316_v13, %v1312_v61  ;;  %v860_v57 = vunpack.c.3.s8 %v548_v10 }
 0x186   : > { %1792 = vmatpush.bf16.msra.mxu0 %v1373_v18  ;;  %1806 = vmatpush.bf16.msra.mxu1 %v1405_v43  ;;  %v1065_v46 = vcvt.s32.f32 %v681_v0  ;;  %v1069_v30 = vcvt.s32.f32 %v685_v25  ;;  %v920_v32 = vunpack.c.2.s8 %v564_v29  ;;  %v924_v55 = vunpack.c.3.s8 %v564_v29 }
 0x187   : > { %1766 = vmatpush.bf16.msrb.mxu2 %v1492_v7  ;;  %1780 = vmatpush.bf16.msrb.mxu3 %v1524_v2  ;;  %v1365_v9 = vpack.c.bf16 %v1005_v34, %v1001_v42  ;;  %v1240_v54 = vcvt.s32.f32 %v856_v35  ;;  %v1244_v37 = vcvt.s32.f32 %v860_v57  ;;  %v609_v22 = vunpack.c.0.s8 %v489_v17  ;;  %v544_v7 = vld [vmem:[%s2467_s10 + $0x210] sm:$0xff] }
 0x188   : > { %v1397_v24 = vpack.c.bf16 %v1069_v30, %v1065_v46  ;;  %v613_v1 = vunpack.c.1.s8 %v489_v17  ;;  %v1304_v39 = vcvt.s32.f32 %v920_v32  ;;  %v1308_v62 = vcvt.s32.f32 %v924_v55  ;;  %v525_v32 = vld [vmem:[%s2467_s10 + $0x178] sm:$0xff] }
 0x189   : > { %v673_v51 = vunpack.c.0.s8 %v505_v41  ;;  %v677_v6 = vunpack.c.1.s8 %v505_v41  ;;  %v1484_v36 = vpack.c.bf16 %v1244_v37, %v1240_v54  ;;  %v993_v8 = vcvt.s32.f32 %v609_v22  ;;  %v560_v41 = vld [vmem:[%s2467_s10 + $0x290] sm:$0xff] }
 0x18a   : > { %1793 = vmatpush.bf16.msra.mxu0 %v1369_v15  ;;  %1807 = vmatpush.bf16.msra.mxu1 %v1401_v63  ;;  %v997_v18 = vcvt.s32.f32 %v613_v1  ;;  %v848_v47 = vunpack.c.0.s8 %v548_v10  ;;  %v1516_v52 = vpack.c.bf16 %v1308_v62, %v1304_v39  ;;  %v852_v19 = vunpack.c.1.s8 %v548_v10  ;;  %v541_v1 = vld [vmem:[%s2467_s10 + $0x1f8] sm:$0xff] }
 0x18b   : > { %1767 = vmatpush.bf16.msrb.mxu2 %v1488_v38  ;;  %1781 = vmatpush.bf16.msrb.mxu3 %v1520_v21  ;;  %v1057_v43 = vcvt.s32.f32 %v673_v51  ;;  %v1061_v59 = vcvt.s32.f32 %v677_v6  ;;  %v912_v50 = vunpack.c.0.s8 %v564_v29  ;;  %v916_v60 = vunpack.c.1.s8 %v564_v29 }
 0x18c   : > { %v1361_v45 = vpack.c.bf16 %v997_v18, %v993_v8  ;;  %v1232_v3 = vcvt.s32.f32 %v848_v47  ;;  %v1236_v49 = vcvt.s32.f32 %v852_v19  ;;  %v601_v33 = vunpack.c.2.s8 %v485_v4 }
 0x18d   : > { %v1393_v11 = vpack.c.bf16 %v1061_v59, %v1057_v43  ;;  %v605_v17 = vunpack.c.3.s8 %v485_v4  ;;  %v1296_v2 = vcvt.s32.f32 %v912_v50  ;;  %v1300_v40 = vcvt.s32.f32 %v916_v60 }
 0x18e   : > { %1794 = vmatpush.bf16.msra.mxu0 %v1365_v9  ;;  %1808 = vmatpush.bf16.msra.mxu1 %v1397_v24  ;;  %v665_v16 = vunpack.c.2.s8 %v501_v56  ;;  %v669_v53 = vunpack.c.3.s8 %v501_v56  ;;  %v1480_v15 = vpack.c.bf16 %v1236_v49, %v1232_v3  ;;  %v985_v14 = vcvt.s32.f32 %v601_v33 }
 0x18f   : > { %1768 = vmatpush.bf16.msrb.mxu2 %v1484_v36  ;;  %1782 = vmatpush.bf16.msrb.mxu3 %v1516_v52  ;;  %v989_v12 = vcvt.s32.f32 %v605_v17  ;;  %v840_v20 = vunpack.c.2.s8 %v544_v7  ;;  %v1512_v10 = vpack.c.bf16 %v1300_v40, %v1296_v2  ;;  %v844_v28 = vunpack.c.3.s8 %v544_v7  ;;  %v481_v36 = vld [vmem:[%s2467_s10 + $0x18] sm:$0xff] }
 0x190   : > { %v1049_v63 = vcvt.s32.f32 %v665_v16  ;;  %v1053_v31 = vcvt.s32.f32 %v669_v53  ;;  %v904_v13 = vunpack.c.2.s8 %v560_v41  ;;  %v908_v0 = vunpack.c.3.s8 %v560_v41 }
 0x191   : > { %v1357_v23 = vpack.c.bf16 %v989_v12, %v985_v14  ;;  %v1224_v61 = vcvt.s32.f32 %v840_v20  ;;  %v1228_v29 = vcvt.s32.f32 %v844_v28  ;;  %v593_v38 = vunpack.c.0.s8 %v485_v4 }
 0x192   : > { %1795 = vmatpush.bf16.msra.mxu0 %v1361_v45  ;;  %1809 = vmatpush.bf16.msra.mxu1 %v1393_v11  ;;  %v1389_v25 = vpack.c.bf16 %v1053_v31, %v1049_v63  ;;  %v597_v42 = vunpack.c.1.s8 %v485_v4  ;;  %v1288_v34 = vcvt.s32.f32 %v904_v13  ;;  %v1292_v35 = vcvt.s32.f32 %v908_v0  ;;  %v557_v13 = vld [vmem:[%s2467_s10 + $0x278] sm:$0xff] }
 0x193   : > { %1769 = vmatpush.bf16.msrb.mxu2 %v1480_v15  ;;  %1783 = vmatpush.bf16.msrb.mxu3 %v1512_v10  ;;  %v657_v21 = vunpack.c.0.s8 %v501_v56  ;;  %v661_v46 = vunpack.c.1.s8 %v501_v56  ;;  %v1476_v30 = vpack.c.bf16 %v1228_v29, %v1224_v61  ;;  %v977_v57 = vcvt.s32.f32 %v593_v38  ;;  %v497_v56 = vld [vmem:[%s2467_s10 + $0x98] sm:$0xff] }
 0x194   : > { %v981_v9 = vcvt.s32.f32 %v597_v42  ;;  %v832_v54 = vunpack.c.0.s8 %v544_v7  ;;  %v1508_v55 = vpack.c.bf16 %v1292_v35, %v1288_v34  ;;  %v836_v22 = vunpack.c.1.s8 %v544_v7  ;;  %v573_v42 = vld [vmem:[%s2467_s10 + $0x2f8] sm:$0xff] }
 0x195   : > { %v1041_v24 = vcvt.s32.f32 %v657_v21  ;;  %v1045_v37 = vcvt.s32.f32 %v661_v46  ;;  %v896_v51 = vunpack.c.0.s8 %v560_v41  ;;  %v900_v6 = vunpack.c.1.s8 %v560_v41 }
 0x196   : > { %1796 = vmatpush.bf16.msra.mxu0 %v1357_v23  ;;  %1810 = vmatpush.bf16.msra.mxu1 %v1389_v25  ;;  %v1353_v39 = vpack.c.bf16 %v981_v9, %v977_v57  ;;  %v1216_v62 = vcvt.s32.f32 %v832_v54  ;;  %v1220_v18 = vcvt.s32.f32 %v836_v22  ;;  %v761_v47 = vunpack.c.2.s8 %v525_v32 }
 0x197   : > { %1770 = vmatpush.bf16.msrb.mxu2 %v1476_v30  ;;  %1784 = vmatpush.bf16.msrb.mxu3 %v1508_v55  ;;  %v1385_v8 = vpack.c.bf16 %v1045_v37, %v1041_v24  ;;  %v765_v4 = vunpack.c.3.s8 %v525_v32  ;;  %v1280_v52 = vcvt.s32.f32 %v896_v51  ;;  %v1284_v43 = vcvt.s32.f32 %v900_v6  ;;  %v521_v30 = vld [vmem:[%s2467_s10 + $0x158] sm:$0xff] }
 0x198   : > { %v825_v59 = vunpack.c.2.s8 %v541_v1  ;;  %v829_v19 = vunpack.c.3.s8 %v541_v1  ;;  %v1472_v45 = vpack.c.bf16 %v1220_v18, %v1216_v62  ;;  %v1145_v3 = vcvt.s32.f32 %v761_v47 }
 0x199   : > { %v1149_v50 = vcvt.s32.f32 %v765_v4  ;;  %v585_v60 = vunpack.c.2.s8 %v481_v36  ;;  %v1504_v7 = vpack.c.bf16 %v1284_v43, %v1280_v52  ;;  %v589_v33 = vunpack.c.3.s8 %v481_v36 }
 0x19a   : > { %1797 = vmatpush.bf16.msra.mxu0 %v1353_v39  ;;  %1811 = vmatpush.bf16.msra.mxu1 %v1385_v8  ;;  %v1209_v11 = vcvt.s32.f32 %v825_v59  ;;  %v1213_v49 = vcvt.s32.f32 %v829_v19  ;;  %v649_v40 = vunpack.c.2.s8 %v497_v56  ;;  %v653_v16 = vunpack.c.3.s8 %v497_v56 }
 0x19b   : > { %1771 = vmatpush.bf16.msrb.mxu2 %v1472_v45  ;;  %v1437_v17 = vpack.c.bf16 %v1149_v50, %v1145_v3  ;;  %v969_v2 = vcvt.s32.f32 %v585_v60  ;;  %1785 = vmatpush.bf16.msrb.mxu3 %v1504_v7  ;;  %v973_v41 = vcvt.s32.f32 %v589_v33  ;;  %v753_v15 = vunpack.c.0.s8 %v525_v32 }
 0x19c   : > { %v1469_v53 = vpack.c.bf16 %v1213_v49, %v1209_v11  ;;  %v757_v14 = vunpack.c.1.s8 %v525_v32  ;;  %v1033_v12 = vcvt.s32.f32 %v649_v40  ;;  %v1037_v20 = vcvt.s32.f32 %v653_v16  ;;  %v553_v40 = vld [vmem:[%s2467_s10 + $0x258] sm:$0xff] }
 0x19d   : > { %v817_v10 = vunpack.c.0.s8 %v541_v1  ;;  %v821_v63 = vunpack.c.1.s8 %v541_v1  ;;  %v1349_v31 = vpack.c.bf16 %v973_v41, %v969_v2  ;;  %v1137_v28 = vcvt.s32.f32 %v753_v15  ;;  %v537_v1 = vld [vmem:[%s2467_s10 + $0x1d8] sm:$0xff] }
 0x19e   : > { %1772 = vmatmul.bf16.vlgmr.msrb.gmra.mxu2 %v2798_v26  ;;  %v1141_v23 = vcvt.s32.f32 %v757_v14  ;;  %v577_v61 = vunpack.c.0.s8 %v481_v36  ;;  %v1381_v0 = vpack.c.bf16 %v1037_v20, %v1033_v12  ;;  %1786 = vmatmul.bf16.vlgmr.msrb.gmra.mxu3 %v2800_v27  ;;  %v581_v38 = vunpack.c.1.s8 %v481_v36  ;;  %v569_v14 = vld [vmem:[%s2467_s10 + $0x2d8] sm:$0xff] }
 0x19f   : > { %1820 = vmatpush.bf16.msra.mxu2 %v1437_v17  ;;  %1834 = vmatpush.bf16.msra.mxu3 %v1469_v53  ;;  %v1201_v25 = vcvt.s32.f32 %v817_v10  ;;  %v1205_v29 = vcvt.s32.f32 %v821_v63  ;;  %v641_v21 = vunpack.c.0.s8 %v497_v56  ;;  %v645_v46 = vunpack.c.1.s8 %v497_v56 }
 0x1a0   : > { %1798 = vmatpush.bf16.msra.mxu0 %v1349_v31  ;;  %v1433_v34 = vpack.c.bf16 %v1141_v23, %v1137_v28  ;;  %v961_v35 = vcvt.s32.f32 %v577_v61  ;;  %1812 = vmatpush.bf16.msra.mxu1 %v1381_v0  ;;  %v965_v9 = vcvt.s32.f32 %v581_v38  ;;  %v889_v54 = vunpack.c.2.s8 %v557_v13 }
 0x1a1   : > { %v1465_v57 = vpack.c.bf16 %v1205_v29, %v1201_v25  ;;  %v893_v32 = vunpack.c.3.s8 %v557_v13  ;;  %v1025_v55 = vcvt.s32.f32 %v641_v21  ;;  %v1029_v24 = vcvt.s32.f32 %v645_v46  ;;  %v533_v29 = vld [vmem:[%s2467_s10 + $0x1b8] sm:$0xff] }
 0x1a2   : > { %v953_v37 = vunpack.c.2.s8 %v573_v42  ;;  %v957_v22 = vunpack.c.3.s8 %v573_v42  ;;  %v1345_v39 = vpack.c.bf16 %v965_v9, %v961_v35  ;;  %v1273_v62 = vcvt.s32.f32 %v889_v54 }
 0x1a3   : > { %1821 = vmatpush.bf16.msra.mxu2 %v1433_v34  ;;  %1835 = vmatpush.bf16.msra.mxu3 %v1465_v57  ;;  %v1277_v51 = vcvt.s32.f32 %v893_v32  ;;  %v745_v6 = vunpack.c.2.s8 %v521_v30  ;;  %v1377_v36 = vpack.c.bf16 %v1029_v24, %v1025_v55  ;;  %v749_v47 = vunpack.c.3.s8 %v521_v30 }
 0x1a4   : > { %v1337_v8 = vcvt.s32.f32 %v953_v37  ;;  %v1341_v18 = vcvt.s32.f32 %v957_v22  ;;  %1799 = vmatpush.bf16.msra.mxu0 %v1345_v39  ;;  %v809_v43 = vunpack.c.2.s8 %v537_v1  ;;  %v813_v59 = vunpack.c.3.s8 %v537_v1 }
 0x1a5   : > { %v1501_v4 = vpack.c.bf16 %v1277_v51, %v1273_v62  ;;  %v1129_v52 = vcvt.s32.f32 %v745_v6  ;;  %1813 = vmatpush.bf16.msra.mxu1 %v1377_v36  ;;  %v1133_v56 = vcvt.s32.f32 %v749_v47  ;;  %v881_v45 = vunpack.c.0.s8 %v557_v13 }
 0x1a6   : > { %v1533_v19 = vpack.c.bf16 %v1341_v18, %v1337_v8  ;;  %v885_v3 = vunpack.c.1.s8 %v557_v13  ;;  %v1193_v50 = vcvt.s32.f32 %v809_v43  ;;  %v1197_v60 = vcvt.s32.f32 %v813_v59 }
 0x1a7   : > { %v945_v7 = vunpack.c.0.s8 %v573_v42  ;;  %v949_v11 = vunpack.c.1.s8 %v573_v42  ;;  %1800 = vmatmul.bf16.vlgmr.msra.gmra.mxu0 %v2665_v44  ;;  %v1429_v49 = vpack.c.bf16 %v1133_v56, %v1129_v52  ;;  %v1265_v33 = vcvt.s32.f32 %v881_v45  ;;  %v517_v44 = vld [vmem:[%s2467_s10 + $0x138] sm:$0xff] }
 0x1a8   : > { %1848 = vmatpush.bf16.msrb.mxu0 %v1501_v4  ;;  %v1269_v17 = vcvt.s32.f32 %v885_v3  ;;  %v737_v2 = vunpack.c.0.s8 %v521_v30  ;;  %1814 = vmatmul.bf16.vlgmr.msra.gmra.mxu1 %v2667_v48  ;;  %v1461_v16 = vpack.c.bf16 %v1197_v60, %v1193_v50  ;;  %v741_v15 = vunpack.c.1.s8 %v521_v30  ;;  %v549_v4 = vld [vmem:[%s2467_s10 + $0x238] sm:$0xff] }
 0x1a9   : > { %1862 = vmatpush.bf16.msrb.mxu1 %v1533_v19  ;;  %v1329_v53 = vcvt.s32.f32 %v945_v7  ;;  %v1333_v41 = vcvt.s32.f32 %v949_v11  ;;  %1822 = vmatpush.bf16.msra.mxu2 %v1429_v49  ;;  %v801_v10 = vunpack.c.0.s8 %v537_v1  ;;  %v805_v63 = vunpack.c.1.s8 %v537_v1  ;;  %v565_v56 = vld [vmem:[%s2467_s10 + $0x2b8] sm:$0xff] }
 0x1aa   : > { %v1497_v12 = vpack.c.bf16 %v1269_v17, %v1265_v33  ;;  %v1121_v20 = vcvt.s32.f32 %v737_v2  ;;  %1836 = vmatpush.bf16.msra.mxu3 %v1461_v16  ;;  %v1125_v28 = vcvt.s32.f32 %v741_v15  ;;  %v873_v23 = vunpack.c.2.s8 %v553_v40  ;;  %v513_v7 = vld [vmem:[%s2467_s10 + $0x118] sm:$0xff] }
 0x1ab   : > { %v1529_v31 = vpack.c.bf16 %v1333_v41, %v1329_v53  ;;  %v877_v61 = vunpack.c.3.s8 %v553_v40  ;;  %v1185_v13 = vcvt.s32.f32 %v801_v10  ;;  %v1189_v48 = vcvt.s32.f32 %v805_v63  ;;  %v529_v41 = vld [vmem:[%s2467_s10 + $0x198] sm:$0xff] }
 0x1ac   : > { %1849 = vmatpush.bf16.msrb.mxu0 %v1497_v12  ;;  %v937_v0 = vunpack.c.2.s8 %v569_v14  ;;  %v941_v25 = vunpack.c.3.s8 %v569_v14  ;;  %v1425_v38 = vpack.c.bf16 %v1125_v28, %v1121_v20  ;;  %v1257_v42 = vcvt.s32.f32 %v873_v23 }
 0x1ad   : > { %1863 = vmatpush.bf16.msrb.mxu1 %v1529_v31  ;;  %v1261_v34 = vcvt.s32.f32 %v877_v61  ;;  %v729_v35 = vunpack.c.2.s8 %v517_v44  ;;  %v1457_v21 = vpack.c.bf16 %v1189_v48, %v1185_v13  ;;  %v733_v57 = vunpack.c.3.s8 %v517_v44 }
 0x1ae   : > { %v1321_v46 = vcvt.s32.f32 %v937_v0  ;;  %v1325_v30 = vcvt.s32.f32 %v941_v25  ;;  %1823 = vmatpush.bf16.msra.mxu2 %v1425_v38  ;;  %v793_v32 = vunpack.c.2.s8 %v533_v29  ;;  %v797_v55 = vunpack.c.3.s8 %v533_v29 }
 0x1af   : > { %v1493_v9 = vpack.c.bf16 %v1261_v34, %v1257_v42  ;;  %v1113_v54 = vcvt.s32.f32 %v729_v35  ;;  %1837 = vmatpush.bf16.msra.mxu3 %v1457_v21  ;;  %v1117_v37 = vcvt.s32.f32 %v733_v57  ;;  %v865_v22 = vunpack.c.0.s8 %v553_v40 }
 0x1b0   : > { %v1525_v24 = vpack.c.bf16 %v1325_v30, %v1321_v46  ;;  %v869_v1 = vunpack.c.1.s8 %v553_v40  ;;  %v1177_v39 = vcvt.s32.f32 %v793_v32  ;;  %v1181_v62 = vcvt.s32.f32 %v797_v55 }
 0x1b1   : > { %1850 = vmatpush.bf16.msrb.mxu0 %v1493_v9  ;;  %v929_v51 = vunpack.c.0.s8 %v569_v14  ;;  %v933_v6 = vunpack.c.1.s8 %v569_v14  ;;  %v1421_v36 = vpack.c.bf16 %v1117_v37, %v1113_v54  ;;  %v1249_v8 = vcvt.s32.f32 %v865_v22  ;;  %v545_v9 = vld [vmem:[%s2467_s10 + $0x218] sm:$0xff] }
 0x1b2   : > { %1864 = vmatpush.bf16.msrb.mxu1 %v1525_v24  ;;  %v1253_v18 = vcvt.s32.f32 %v869_v1  ;;  %v721_v47 = vunpack.c.0.s8 %v517_v44  ;;  %v1453_v52 = vpack.c.bf16 %v1181_v62, %v1177_v39  ;;  %v725_v19 = vunpack.c.1.s8 %v517_v44  ;;  %v561_v37 = vld [vmem:[%s2467_s10 + $0x298] sm:$0xff] }
 0x1b3   : > { %v1313_v43 = vcvt.s32.f32 %v929_v51  ;;  %v1317_v59 = vcvt.s32.f32 %v933_v6  ;;  %1824 = vmatpush.bf16.msra.mxu2 %v1421_v36  ;;  %v785_v50 = vunpack.c.0.s8 %v533_v29  ;;  %v789_v60 = vunpack.c.1.s8 %v533_v29 }
 0x1b4   : > { %v1489_v45 = vpack.c.bf16 %v1253_v18, %v1249_v8  ;;  %v1105_v3 = vcvt.s32.f32 %v721_v47  ;;  %1838 = vmatpush.bf16.msra.mxu3 %v1453_v52  ;;  %v1109_v49 = vcvt.s32.f32 %v725_v19  ;;  %v857_v33 = vunpack.c.2.s8 %v549_v4 }
 0x1b5   : > { %v1521_v11 = vpack.c.bf16 %v1317_v59, %v1313_v43  ;;  %v861_v17 = vunpack.c.3.s8 %v549_v4  ;;  %v1169_v2 = vcvt.s32.f32 %v785_v50  ;;  %v1173_v40 = vcvt.s32.f32 %v789_v60 }
 0x1b6   : > { %1851 = vmatpush.bf16.msrb.mxu0 %v1489_v45  ;;  %v921_v16 = vunpack.c.2.s8 %v565_v56  ;;  %v925_v53 = vunpack.c.3.s8 %v565_v56  ;;  %v1417_v15 = vpack.c.bf16 %v1109_v49, %v1105_v3  ;;  %v1241_v14 = vcvt.s32.f32 %v857_v33 }
 0x1b7   : > { %1865 = vmatpush.bf16.msrb.mxu1 %v1521_v11  ;;  %v1245_v12 = vcvt.s32.f32 %v861_v17  ;;  %v713_v20 = vunpack.c.2.s8 %v513_v7  ;;  %v1449_v10 = vpack.c.bf16 %v1173_v40, %v1169_v2  ;;  %v717_v31 = vunpack.c.3.s8 %v513_v7 }
 0x1b8   : > { %v1305_v63 = vcvt.s32.f32 %v921_v16  ;;  %v1309_v44 = vcvt.s32.f32 %v925_v53  ;;  %1825 = vmatpush.bf16.msra.mxu2 %v1417_v15  ;;  %v777_v61 = vunpack.c.2.s8 %v529_v41  ;;  %v781_v13 = vunpack.c.3.s8 %v529_v41 }
 0x1b9   : > { %v1485_v28 = vpack.c.bf16 %v1245_v12, %v1241_v14  ;;  %v1097_v23 = vcvt.s32.f32 %v713_v20  ;;  %1839 = vmatpush.bf16.msra.mxu3 %v1449_v10  ;;  %v1101_v0 = vcvt.s32.f32 %v717_v31  ;;  %v849_v25 = vunpack.c.0.s8 %v549_v4 }
 0x1ba   : > { %v1517_v48 = vpack.c.bf16 %v1309_v44, %v1305_v63  ;;  %v853_v29 = vunpack.c.1.s8 %v549_v4  ;;  %v1161_v38 = vcvt.s32.f32 %v777_v61  ;;  %v1165_v42 = vcvt.s32.f32 %v781_v13 }
 0x1bb   : > { %1852 = vmatpush.bf16.msrb.mxu0 %v1485_v28  ;;  %v913_v34 = vunpack.c.0.s8 %v565_v56  ;;  %v917_v35 = vunpack.c.1.s8 %v565_v56  ;;  %v1413_v21 = vpack.c.bf16 %v1101_v0, %v1097_v23  ;;  %v1233_v46 = vcvt.s32.f32 %v849_v25  ;;  %v3124_v0 = vld [vmem:[%s299_s14] sm:$0xf] }
 0x1bc   : > { %1866 = vmatpush.bf16.msrb.mxu1 %v1517_v48  ;;  %v1237_v30 = vcvt.s32.f32 %v853_v29  ;;  %v705_v57 = vunpack.c.0.s8 %v513_v7  ;;  %v1445_v54 = vpack.c.bf16 %v1165_v42, %v1161_v38  ;;  %v709_v24 = vunpack.c.1.s8 %v513_v7 }
 0x1bd   : > { %v1297_v32 = vcvt.s32.f32 %v913_v34  ;;  %v1301_v55 = vcvt.s32.f32 %v917_v35  ;;  %1826 = vmatpush.bf16.msra.mxu2 %v1413_v21  ;;  %v769_v39 = vunpack.c.0.s8 %v529_v41  ;;  %v773_v62 = vunpack.c.1.s8 %v529_v41 }
 0x1be   : > { %v1481_v22 = vpack.c.bf16 %v1237_v30, %v1233_v46  ;;  %v1089_v1 = vcvt.s32.f32 %v705_v57  ;;  %1840 = vmatpush.bf16.msra.mxu3 %v1445_v54  ;;  %v1093_v6 = vcvt.s32.f32 %v709_v24  ;;  %v841_v36 = vunpack.c.2.s8 %v545_v9 }
 0x1bf   : > { %v1513_v51 = vpack.c.bf16 %v1301_v55, %v1297_v32  ;;  %v845_v8 = vunpack.c.3.s8 %v545_v9  ;;  %v1153_v18 = vcvt.s32.f32 %v769_v39  ;;  %v1157_v47 = vcvt.s32.f32 %v773_v62  ;;  %v1549_v7 = vpop.f32.mrf.mxu2  ;;  %v1563_v11 = vpop.f32.mrf.mxu3 }
 0x1c0   : > { %1853 = vmatpush.bf16.msrb.mxu0 %v1481_v22  ;;  %v905_v4 = vunpack.c.2.s8 %v561_v37  ;;  %v909_v52 = vunpack.c.3.s8 %v561_v37  ;;  %v1409_v43 = vpack.c.bf16 %v1093_v6, %v1089_v1  ;;  %v1225_v59 = vcvt.s32.f32 %v841_v36  ;;  %v1577_v40 = vpop.f32.mrf.mxu0  ;;  %v1591_v16 = vpop.f32.mrf.mxu1 }
 0x1c1   : > { %1867 = vmatpush.bf16.msrb.mxu1 %v1513_v51  ;;  %v1229_v19 = vcvt.s32.f32 %v845_v8  ;;  %v833_v56 = vunpack.c.0.s8 %v545_v9  ;;  %v1441_v45 = vpack.c.bf16 %v1157_v47, %v1153_v18  ;;  %v837_v60 = vunpack.c.1.s8 %v545_v9 }
 0x1c2   : > { %v1289_v3 = vcvt.s32.f32 %v905_v4  ;;  %v1293_v50 = vcvt.s32.f32 %v909_v52  ;;  %1827 = vmatpush.bf16.msra.mxu2 %v1409_v43  ;;  %v897_v17 = vunpack.c.0.s8 %v561_v37  ;;  %v901_v2 = vunpack.c.1.s8 %v561_v37 }
 0x1c3   : > { %v1477_v49 = vpack.c.bf16 %v1229_v19, %v1225_v59  ;;  %v1217_v33 = vcvt.s32.f32 %v833_v56  ;;  %1841 = vmatpush.bf16.msra.mxu3 %v1441_v45  ;;  %v1221_v41 = vcvt.s32.f32 %v837_v60  ;;  %v1564_v10 = vadd.f32 %v1563_v11, %v1549_v7 }
 0x1c4   : > { %v1509_v53 = vpack.c.bf16 %v1293_v50, %v1289_v3  ;;  %v1281_v15 = vcvt.s32.f32 %v897_v17  ;;  %v1285_v14 = vcvt.s32.f32 %v901_v2  ;;  %v1896_v34 = vperm.slane %v3124_v0, 0 }
 0x1c5   : > { %1854 = vmatpush.bf16.msrb.mxu0 %v1477_v49  ;;  %1828 = vmatmul.bf16.vlgmr.msra.gmra.mxu2 %v2712_v58  ;;  %v1473_v12 = vpack.c.bf16 %v1221_v41, %v1217_v33  ;;  %v1578_v23 = vadd.f32 %v1577_v40, %v1564_v10  ;;  %v3122_v58 = vld [vmem:[%s294_s15] sm:$0xf]  ;;  %v1897_v52 = vperm.slane %v3124_v0, 1  ;;  %s2273_s15 = scalar_lea.hbm %s3184_s5, 128 }
 0x1c6   : > { %1868 = vmatpush.bf16.msrb.mxu1 %v1509_v53  ;;  %1842 = vmatmul.bf16.vlgmr.msra.gmra.mxu3 %v2714_v5  ;;  %v1505_v20 = vpack.c.bf16 %v1285_v14, %v1281_v15  ;;  %v1879_v18 = vperm.slane %v3122_v58, 1  ;;  %p2275_p2 = scmp.lt.s32.totalorder %s2273_s15, %s2269_s24 }
 0x1c7   : > { %v1551_v63 = vpop.f32.mrf.mxu2  ;;  %v1565_v44 = vpop.f32.mrf.mxu3  ;;  %v1592_v5 = vadd.f32 %v1591_v16, %v1578_v23 }
 0x1c8   : > { %v1579_v31 = vpop.f32.mrf.mxu0  ;;  %v1593_v28 = vpop.f32.mrf.mxu1  ;;  %v1566_v61 = vadd.f32 %v1565_v44, %v1551_v63  ;;  %p2276_p10 = por %p2275_p2, %p2274_p9 }
 0x1c9   : > { %1855 = vmatpush.bf16.msrb.mxu0 %v1473_v12 }
 0x1ca   : > { %1869 = vmatpush.bf16.msrb.mxu1 %v1505_v20  ;;  %v1580_v38 = vadd.f32 %v1579_v31, %v1566_v61  ;;  %v1880_v31 = vperm.slane %v3122_v58, 2  ;;  %v1898_v61 = vperm.slane %v3124_v0, 2  ;;  %p2277_p12 = pnand %p2276_p10, %p2272_p11 }
 0x1cc   : > { %1856 = vmatmul.bf16.vlgmr.msrb.gmra.mxu0 %v2798_v26  ;;  %v1594_v21 = vadd.f32 %v1593_v28, %v1580_v38 }
 0x1cd   : > { %1870 = vmatmul.bf16.vlgmr.msrb.gmra.mxu1 %v2800_v27  ;;  %v1878_v27 = vperm.slane %v3122_v58, 0 }
 0x1cf   : > { %v1605_v13 = vpop.f32.mrf.mxu2  ;;  %v1619_v48 = vpop.f32.mrf.mxu3 }
 0x1d0   : > { %v1606_v26 = vadd.f32 %v1605_v13, %v1592_v5 }
 0x1d1   : > { %v1633_v25 = vpop.f32.mrf.mxu0  ;;  %v1647_v29 = vpop.f32.mrf.mxu1 }
 0x1d2   : > { %v1620_v42 = vadd.f32 %v1619_v48, %v1606_v26  ;;  %v1648_v37 = vadd.f32 %v1647_v29, %v1633_v25 }
 0x1d4   : > { %v1886_v35 = vmul.f32 %v1878_v27, %v1620_v42 }
 0x1d6   : > { %v1904_v46 = vadd.f32 %v1896_v34, %v1886_v35 }
 0x1d7   : > { %v1607_v30 = vpop.f32.mrf.mxu2  ;;  %v1621_v57 = vpop.f32.mrf.mxu3 }
 0x1d8   : > { %1912 = vst [vmem:[%s3129_s26] sm:$0xff] %v1904_v46  ;;  %v1608_v9 = vadd.f32 %v1607_v30, %v1594_v21 }
 0x1d9   : > { %v1635_v54 = vpop.f32.mrf.mxu0  ;;  %v1649_v32 = vpop.f32.mrf.mxu1 }
 0x1da   : > { %v1622_v55 = vadd.f32 %v1621_v57, %v1608_v9  ;;  %v1650_v47 = vadd.f32 %v1649_v32, %v1635_v54 }
 0x1dc   : > { %v1890_v24 = vmul.f32 %v1878_v27, %v1622_v55 }
 0x1de   : > { %v1908_v22 = vadd.f32 %v1896_v34, %v1890_v24 }
 0x1e0   : > { %1916 = vst [vmem:[%s3129_s26 + $0x20] sm:$0xff] %v1908_v22 }
 0x1e2   : > { %v1689_v51 = vpop.f32.mrf.mxu0  ;;  %v1703_v36 = vpop.f32.mrf.mxu1 }
 0x1e3   : > { %v1661_v1 = vpop.f32.mrf.mxu2  ;;  %v1675_v39 = vpop.f32.mrf.mxu3 }
 0x1e4   : > { %v1662_v62 = vadd.f32 %v1661_v1, %v1648_v37 }
 0x1e6   : > { %v1676_v6 = vadd.f32 %v1675_v39, %v1662_v62  ;;  %v1881_v39 = vperm.slane %v3122_v58, 3 }
 0x1e8   : > { %v1690_v8 = vadd.f32 %v1689_v51, %v1676_v6  ;;  %v1899_v6 = vperm.slane %v3124_v0, 3 }
 0x1ea   : > { %v1704_v4 = vadd.f32 %v1703_v36, %v1690_v8  ;;  %v1691_v50 = vpop.f32.mrf.mxu0  ;;  %v1705_v7 = vpop.f32.mrf.mxu1 }
 0x1eb   : > { %v1663_v43 = vpop.f32.mrf.mxu2  ;;  %v1677_v56 = vpop.f32.mrf.mxu3 }
 0x1ec   : > { %v1887_v59 = vmul.f32 %v1879_v18, %v1704_v4  ;;  %v1664_v19 = vadd.f32 %v1663_v43, %v1650_v47 }
 0x1ee   : > { %v1905_v45 = vadd.f32 %v1897_v52, %v1887_v59  ;;  %v1678_v3 = vadd.f32 %v1677_v56, %v1664_v19 }
 0x1f0   : > { %1913 = vst [vmem:[%s3129_s26 + $0x8] sm:$0xff] %v1905_v45  ;;  %v1692_v60 = vadd.f32 %v1691_v50, %v1678_v3 }
 0x1f2   : > { %v1706_v11 = vadd.f32 %v1705_v7, %v1692_v60 }
 0x1f4   : > { %v1891_v49 = vmul.f32 %v1879_v18, %v1706_v11 }
 0x1f6   : > { %v1909_v33 = vadd.f32 %v1897_v52, %v1891_v49 }
 0x1f8   : > { %1917 = vst [vmem:[%s3129_s26 + $0x28] sm:$0xff] %v1909_v33 }
 0x202   : > { %v1745_v16 = vpop.f32.mrf.mxu0  ;;  %v1759_v14 = vpop.f32.mrf.mxu1 }
 0x203   : > { %v1717_v17 = vpop.f32.mrf.mxu2  ;;  %v1731_v2 = vpop.f32.mrf.mxu3 }
 0x204   : > { %v1732_v40 = vadd.f32 %v1731_v2, %v1717_v17 }
 0x206   : > { %v1746_v15 = vadd.f32 %v1745_v16, %v1732_v40 }
 0x208   : > { %v1760_v12 = vadd.f32 %v1759_v14, %v1746_v15 }
 0x20a   : > { %v1747_v28 = vpop.f32.mrf.mxu0  ;;  %v1761_v48 = vpop.f32.mrf.mxu1 }
 0x20b   : > { %v1719_v53 = vpop.f32.mrf.mxu2  ;;  %v1733_v41 = vpop.f32.mrf.mxu3 }
 0x20c   : > { %v1734_v20 = vadd.f32 %v1733_v41, %v1719_v53 }
 0x20e   : > { %v1748_v23 = vadd.f32 %v1747_v28, %v1734_v20 }
 0x210   : > { %v1762_v26 = vadd.f32 %v1761_v48, %v1748_v23 }
 0x221   : > { %v1773_v10 = vpop.f32.mrf.mxu2  ;;  %v1787_v44 = vpop.f32.mrf.mxu3 }
 0x222   : > { %v1774_v63 = vadd.f32 %v1773_v10, %v1760_v12 }
 0x224   : > { %v1788_v5 = vadd.f32 %v1787_v44, %v1774_v63  ;;  %v1801_v21 = vpop.f32.mrf.mxu0 }
 0x225   : > { %v1815_v46 = vpop.f32.mrf.mxu1 }
 0x226   : > { %v1888_v13 = vmul.f32 %v1880_v31, %v1788_v5  ;;  %v1816_v9 = vadd.f32 %v1815_v46, %v1801_v21 }
 0x228   : > { %v1906_v27 = vadd.f32 %v1898_v61, %v1888_v13 }
 0x229   : > { %v1775_v25 = vpop.f32.mrf.mxu2  ;;  %v1789_v38 = vpop.f32.mrf.mxu3 }
 0x22a   : > { %1914 = vst [vmem:[%s3129_s26 + $0x10] sm:$0xff] %v1906_v27  ;;  %v1776_v29 = vadd.f32 %v1775_v25, %v1762_v26 }
 0x22c   : > { %v1790_v42 = vadd.f32 %v1789_v38, %v1776_v29  ;;  %v1803_v30 = vpop.f32.mrf.mxu0 }
 0x22d   : > { %v1817_v57 = vpop.f32.mrf.mxu1 }
 0x22e   : > { %v1892_v34 = vmul.f32 %v1880_v31, %v1790_v42  ;;  %v1818_v62 = vadd.f32 %v1817_v57, %v1803_v30 }
 0x230   : > { %v1910_v35 = vadd.f32 %v1898_v61, %v1892_v34 }
 0x232   : > { %1918 = vst [vmem:[%s3129_s26 + $0x30] sm:$0xff] %v1910_v35 }
 0x248   : > { %v1829_v54 = vpop.f32.mrf.mxu2 }
 0x249   : > { %v1830_v32 = vadd.f32 %v1829_v54, %v1816_v9  ;;  %v1843_v55 = vpop.f32.mrf.mxu3  ;;  %v1857_v24 = vpop.f32.mrf.mxu0 }
 0x24a   : > { %v1871_v22 = vpop.f32.mrf.mxu1 }
 0x24b   : > { %v1844_v37 = vadd.f32 %v1843_v55, %v1830_v32 }
 0x24d   : > { %v1858_v1 = vadd.f32 %v1857_v24, %v1844_v37 }
 0x24f   : > { %v1872_v51 = vadd.f32 %v1871_v22, %v1858_v1 }
 0x250   : > { %v1831_v36 = vpop.f32.mrf.mxu2 }
 0x251   : > { %v1889_v8 = vmul.f32 %v1881_v39, %v1872_v51  ;;  %v1832_v18 = vadd.f32 %v1831_v36, %v1818_v62  ;;  %v1845_v47 = vpop.f32.mrf.mxu3  ;;  %v1859_v43 = vpop.f32.mrf.mxu0 }
 0x252   : > { %v1873_v59 = vpop.f32.mrf.mxu1 }
 0x253   : > { %v1907_v4 = vadd.f32 %v1899_v6, %v1889_v8  ;;  %v1846_v52 = vadd.f32 %v1845_v47, %v1832_v18 }
 0x255   : > { %1915 = vst [vmem:[%s3129_s26 + $0x18] sm:$0xff] %v1907_v4  ;;  %v1860_v58 = vadd.f32 %v1859_v43, %v1846_v52 }
 0x257   : > { %v1874_v0 = vadd.f32 %v1873_v59, %v1860_v58 }
 0x259   : > { %v1893_v19 = vmul.f32 %v1881_v39, %v1874_v0 }
 0x25b   : > { %v1911_v56 = vadd.f32 %v1899_v6, %v1893_v19 }
 0x25d   : > { %1919 = vst [vmem:[%s3129_s26 + $0x38] sm:$0xff] %v1911_v56 }
 0x25e   : > { %2280 = shalt.err (!%p2277_p12)
}
 0x25f   : > { %s2333_s1 = smov 512   ;;  %s2334_s14 = smov 1024  }
 0x260   : > { %s2335_s16 = smov 32  }
 0x261   : > { %2131 = dma.vmem_to_hbm [thread:$0]  (%p2433_p7), %s1934_s27, 1024, %s1936_s28, %s1921_s22, %s2333_s1, %s2334_s14, %s2335_s16  }
 0x262 PF: > { %s1950_s26 = sand.u32 1, %s2311_s18   ;;  %p3235_p13 = scmp.ge.s32.totalorder %s2323_s21, 2 }
 0x263   : > { %s1951_s30 = scalar_lea.sflag [#allocation4], %s1950_s26 }
 0x264   : > { %p2142_p0 = pnand %p3235_p13, %p2401_p6 }
 0x266   : > { %p2143_p3 = pneg %p2142_p0 }
 0x268   : > { %2306 = dma.done.wait (%p2143_p3), %s1951_s30, 1024  }
 0x269   : > { %2308 = vsyncadd (%p2143_p3), %s1951_s30, 4294966272  ;;  %p19_p5 = scmp.ge.s32.totalorder %s2419_s7, 4   ;;  %s3236_s18 = smov %s2315_s19 }
 0x26a   : > { %s3237_s19 = smov %s2319_s20  ;;  %s3238_s20 = smov %s2429_s12 }
 0x26b   : > { %s3239_s21 = smov %s2419_s7  ;;  %21 = sbr.rel (!%p19_p5) target bundleno = 8 (0x8), region = 96 }
 0x270   :  { %1957 = vsyncpa [#allocation3], 1 }
 0x271   :  { %1959 = vsyncpa [#allocation3 + $0x1], 1 }
 0x272   :  { %1960 = vsyncpa [#allocation6], 1 }
 0x273   :  { %1962 = vsyncpa [#allocation6 + $0x1], 1 }
 0x274   :  { %1963 = vsyncpa [#allocation4], 1 }
 0x275   :  { %1965 = vsyncpa [#allocation4 + $0x1], 1 }

</bundles_post_ra>
